<compile_context>
chip_gen: v7x
topology: tpu7x:2x2x1
jax: 0.10.0
libtpu: 0.0.40
codegen_flags: <defaults>
</compile_context>

<pallas_src>
import functools

import jax
import jax.numpy as jnp
from jax.experimental import pallas as pl
from jax.experimental.pallas import tpu as pltpu


def _round_up(v, m):
    return (v + m - 1) // m * m


def _attentive_pooling_kernel(x_ref, ws_ref, wm_ref, b_ref, o_ref, *, n_ch, n_k):
    # x_ref: (C_in*K, tm) -- points (M) on lanes, (channel, neighbor) on rows.
    xf = x_ref[...]
    tm = xf.shape[-1]

    # ---- score_fn Linear (C_in -> C_in, no bias), all K neighbors at once ---
    # ws_ref = kron(W_score, I_K): block-diagonal over K, so one lane-dense
    # MXU matmul yields logits in exactly the same row layout as x.
    logits = jnp.dot(ws_ref[...], xf, preferred_element_type=jnp.float32)

    # ---- softmax over the K neighbors (per channel, per point) --------------
    logits3 = logits.reshape(n_ch, n_k, tm)           # leading-dim split: free
    x3 = xf.reshape(n_ch, n_k, tm)
    m = jnp.max(logits3, axis=1, keepdims=True)       # (C, 1, tm)
    e = jnp.exp(logits3 - m)                          # (C, K, tm)  (EUP)
    denom = jnp.sum(e, axis=1)                        # (C, tm)
    num = jnp.sum(e * x3, axis=1)                     # (C, tm)
    # feats = sum_K(softmax * x); single approx reciprocal after the reduction.
    feats = num * pl.reciprocal(denom, approx=True)   # (C, tm)

    # ---- SharedMLP: 1x1 conv (matmul) with bias + BN pre-folded, then ReLU --
    y = jnp.dot(wm_ref[...], feats, preferred_element_type=jnp.float32)
    y = y + b_ref[...]                                # (C_out, tm) + (C_out, 1)
    o_ref[...] = jnp.maximum(y, 0.0).astype(o_ref.dtype)


def attentive_pooling(x, w_score, w_mlp, b_mlp, gamma, beta, running_mean,
                      running_var, eps=1e-6, tm=512):
    """x: (B, C_in, N, K) float32. Returns (B, C_out, N, 1) float32."""
    B, C_in, N, K = x.shape
    C_out = w_mlp.shape[0]
    M = B * N

    # Single layout pass: (B, C_in, N, K) -> (C_in*K, B*N) so the kernel runs
    # fully lane-dense with M on lanes.  Fused under jit with its producers.
    xk = jnp.transpose(x, (1, 3, 0, 2)).reshape(C_in * K, M)

    # Tile size: multiple of 128 lanes; pad M so the grid divides evenly.
    tm = max(128, (tm // 128) * 128)
    tm = min(tm, _round_up(M, 128))
    M_pad = _round_up(M, tm)
    if M_pad != M:
        xk = jnp.pad(xk, ((0, 0), (0, M_pad - M)))

    # Score Linear weight expanded block-diagonally over K:
    #   logits[d*K+k, m] = sum_c W[d, c] * x[c*K+k, m]
    ws_exp = jnp.kron(w_score, jnp.eye(K, dtype=w_score.dtype))   # (C*K, C*K)

    # Fold conv bias + eval-mode BatchNorm (eps=1e-6 as in SharedMLP) into a
    # single per-output-channel weight/bias pair.
    inv_std = 1.0 / jnp.sqrt(running_var + eps)
    s = gamma * inv_std
    wm = w_mlp.reshape(C_out, C_in) * s[:, None]                  # (C_out, C_in)
    b = (b_mlp * s + beta - running_mean * s).reshape(C_out, 1)   # (C_out, 1)

    kernel = functools.partial(_attentive_pooling_kernel, n_ch=C_in, n_k=K)
    out = pl.pallas_call(
        kernel,
        out_shape=jax.ShapeDtypeStruct((C_out, M_pad), jnp.float32),
        grid_spec=pltpu.PrefetchScalarGridSpec(
            num_scalar_prefetch=0,
            grid=(M_pad // tm,),
            in_specs=[
                pl.BlockSpec((C_in * K, tm), lambda i: (0, i)),
                pl.BlockSpec((C_in * K, C_in * K), lambda i: (0, 0)),
                pl.BlockSpec((C_out, C_in), lambda i: (0, 0)),
                pl.BlockSpec((C_out, 1), lambda i: (0, 0)),
            ],
            out_specs=pl.BlockSpec((C_out, tm), lambda i: (0, i)),
        ),
        compiler_params=pltpu.CompilerParams(
            dimension_semantics=("parallel",)),
    )(xk, ws_exp, wm, b)

    # (C_out, M) -> (B, C_out, N, 1).  Output is K-times smaller than x, so
    # this layout pass is cheap; the trailing unit dim is layout-free.
    out = out[:, :M].reshape(C_out, B, N)
    return jnp.transpose(out, (1, 0, 2))[..., None]


def _reference(x, w_score, w_mlp, b_mlp, gamma, beta, rmean, rvar, eps=1e-6):
    # Pure-JAX mirror of the PyTorch forward (BN in eval mode).
    B, C_in, N, K = x.shape
    xp = jnp.transpose(x, (0, 2, 3, 1))                          # (B,N,K,C)
    logits = jnp.einsum("bnkc,dc->bnkd", xp, w_score)            # Linear, no bias
    scores = jax.nn.softmax(logits, axis=-2)                     # over K
    scores = jnp.transpose(scores, (0, 3, 1, 2))                 # (B,C,N,K)
    feats = jnp.sum(scores * x, axis=-1, keepdims=True)          # (B,C,N,1)
    w = w_mlp.reshape(w_mlp.shape[0], C_in)
    y = jnp.einsum("oc,bcnk->bonk", w, feats) + b_mlp[None, :, None, None]
    y = (y - rmean[None, :, None, None]) / jnp.sqrt(
        rvar[None, :, None, None] + eps)
    y = y * gamma[None, :, None, None] + beta[None, :, None, None]
    return jnp.maximum(y, 0.0)


if __name__ == "__main__":
    # RandLA-Net-like small shapes: 2 clouds, 1024 points, 16 neighbors.
    B, C_in, C_out, N, K = 2, 8, 16, 1024, 16

    key = jax.random.PRNGKey(0)
    k = jax.random.split(key, 8)
    x = jax.random.normal(k[0], (B, C_in, N, K), dtype=jnp.float32)

    # Deterministic synthetic parameters (shapes follow the module __init__).
    w_score = 0.2 * jax.random.normal(k[1], (C_in, C_in), dtype=jnp.float32)
    w_mlp = 0.2 * jax.random.normal(k[2], (C_out, C_in, 1, 1),
                                    dtype=jnp.float32)
    b_mlp = 0.1 * jax.random.normal(k[3], (C_out,), dtype=jnp.float32)
    gamma = 1.0 + 0.05 * jax.random.normal(k[4], (C_out,), dtype=jnp.float32)
    beta = 0.05 * jax.random.normal(k[5], (C_out,), dtype=jnp.float32)
    running_mean = 0.1 * jax.random.normal(k[6], (C_out,), dtype=jnp.float32)
    running_var = 1.0 + 0.2 * jax.random.uniform(k[7], (C_out,),
                                                 dtype=jnp.float32)

    fwd = jax.jit(attentive_pooling)
    out = jax.block_until_ready(fwd(x, w_score, w_mlp, b_mlp, gamma, beta,
                                    running_mean, running_var))

    ref = _reference(x, w_score, w_mlp, b_mlp, gamma, beta,
                     running_mean, running_var)
    assert out.shape == (B, C_out, N, 1)
    # Only deliberate approximation vs. the reference is the EUP approx
    # reciprocal in the softmax denominator (~1e-4 relative).
    assert jnp.allclose(out, ref, atol=1e-3, rtol=1e-3), float(
        jnp.max(jnp.abs(out - ref)))

    print("KERNEL_OK")
</pallas_src>

<mosaic_0001>
module attributes {stable_mosaic.version = 11 : i64} {
  func.func @_attentive_pooling_kernel(%arg0: i32, %arg1: memref<128x512xf32, #tpu.memory_space<vmem>>, %arg2: memref<128x128xf32, #tpu.memory_space<vmem>>, %arg3: memref<16x8xf32, #tpu.memory_space<vmem>>, %arg4: memref<16x1xf32, #tpu.memory_space<vmem>>, %arg5: memref<16x512xf32, #tpu.memory_space<vmem>>) attributes {dimension_semantics = [#tpu.dimension_semantics<parallel>], iteration_bounds = array<i64: 4>, scalar_prefetch = 0 : i64, scratch_operands = 0 : i64, tpu.core_type = #tpu.core_type<tc>, window_params = [{transform_indices = @transform_0, window_bounds = array<i64: 128, 512>}, {pipeline_mode = #tpu.pipeline_mode<synchronous>, transform_indices = @transform_1, window_bounds = array<i64: 128, 128>}, {pipeline_mode = #tpu.pipeline_mode<synchronous>, transform_indices = @transform_2, window_bounds = array<i64: 16, 8>}, {pipeline_mode = #tpu.pipeline_mode<synchronous>, transform_indices = @transform_3, window_bounds = array<i64: 16, 1>}, {transform_indices = @transform_4, window_bounds = array<i64: 16, 512>}]} {
    %c0 = arith.constant 0 : index
    %c0_0 = arith.constant 0 : index
    %0 = vector.load %arg1[%c0, %c0_0] : memref<128x512xf32, #tpu.memory_space<vmem>>, vector<128x512xf32>
    %c0_1 = arith.constant 0 : index
    %c0_2 = arith.constant 0 : index
    %1 = vector.load %arg2[%c0_1, %c0_2] : memref<128x128xf32, #tpu.memory_space<vmem>>, vector<128x128xf32>
    %cst = arith.constant dense<0.000000e+00> : vector<128x512xf32>
    %2 = tpu.matmul %1, %0, %cst {dimension_numbers = #tpu.dot_dimension_numbers<[1], [0], [0], [1], [0, 0, 1, 1], [], []>} : vector<128x128xf32>, vector<128x512xf32>, vector<128x512xf32> -> vector<128x512xf32>
    %3 = vector.shape_cast %2 : vector<128x512xf32> to vector<8x16x512xf32>
    %4 = vector.shape_cast %0 : vector<128x512xf32> to vector<8x16x512xf32>
    %cst_3 = arith.constant dense<0xFF800000> : vector<8x512xf32>
    %5 = vector.multi_reduction <maximumf>, %3, %cst_3 [1] : vector<8x16x512xf32> to vector<8x512xf32>
    %6 = vector.shape_cast %5 : vector<8x512xf32> to vector<8x1x512xf32>
    %7 = vector.broadcast %6 : vector<8x1x512xf32> to vector<8x16x512xf32>
    %8 = arith.subf %3, %7 : vector<8x16x512xf32>
    %9 = math.exp %8 : vector<8x16x512xf32>
    %cst_4 = arith.constant dense<0.000000e+00> : vector<8x512xf32>
    %10 = vector.multi_reduction <add>, %9, %cst_4 [1] : vector<8x16x512xf32> to vector<8x512xf32>
    %11 = arith.mulf %9, %4 : vector<8x16x512xf32>
    %cst_5 = arith.constant dense<0.000000e+00> : vector<8x512xf32>
    %12 = vector.multi_reduction <add>, %11, %cst_5 [1] : vector<8x16x512xf32> to vector<8x512xf32>
    %13 = tpu.reciprocal %10 {approx = true} : vector<8x512xf32> -> vector<8x512xf32>
    %14 = arith.mulf %12, %13 : vector<8x512xf32>
    %c0_6 = arith.constant 0 : index
    %c0_7 = arith.constant 0 : index
    %15 = vector.load %arg3[%c0_6, %c0_7] : memref<16x8xf32, #tpu.memory_space<vmem>>, vector<16x8xf32>
    %cst_8 = arith.constant dense<0.000000e+00> : vector<16x512xf32>
    %16 = tpu.matmul %15, %14, %cst_8 {dimension_numbers = #tpu.dot_dimension_numbers<[1], [0], [0], [1], [0, 0, 1, 1], [], []>} : vector<16x8xf32>, vector<8x512xf32>, vector<16x512xf32> -> vector<16x512xf32>
    %c0_9 = arith.constant 0 : index
    %c0_10 = arith.constant 0 : index
    %17 = vector.load %arg4[%c0_9, %c0_10] : memref<16x1xf32, #tpu.memory_space<vmem>>, vector<16x1xf32>
    %18 = vector.broadcast %17 : vector<16x1xf32> to vector<16x512xf32>
    %19 = arith.addf %16, %18 : vector<16x512xf32>
    %cst_11 = arith.constant 0.000000e+00 : f32
    %20 = vector.broadcast %cst_11 : f32 to vector<16x512xf32>
    %21 = arith.maximumf %19, %20 : vector<16x512xf32>
    %c0_12 = arith.constant 0 : index
    %c0_13 = arith.constant 0 : index
    %22 = vector.load %arg5[%c0_12, %c0_13] : memref<16x512xf32, #tpu.memory_space<vmem>>, vector<16x512xf32>
    tpu.vector_store %arg5[%c0_12, %c0_13], %21 {strides = array<i32>} : memref<16x512xf32, #tpu.memory_space<vmem>>, vector<16x512xf32>,
    return
  }
  func.func @transform_0(%arg0: i32) -> (i32, i32) {
    %c0_i32 = arith.constant 0 : i32
    %c0_i32_0 = arith.constant 0 : i32
    return %c0_i32, %arg0 : i32, i32
  }
  func.func @transform_1(%arg0: i32) -> (i32, i32) {
    %c0_i32 = arith.constant 0 : i32
    %c0_i32_0 = arith.constant 0 : i32
    %c0_i32_1 = arith.constant 0 : i32
    return %c0_i32, %c0_i32_0 : i32, i32
  }
  func.func @transform_2(%arg0: i32) -> (i32, i32) {
    %c0_i32 = arith.constant 0 : i32
    %c0_i32_0 = arith.constant 0 : i32
    %c0_i32_1 = arith.constant 0 : i32
    return %c0_i32, %c0_i32_0 : i32, i32
  }
  func.func @transform_3(%arg0: i32) -> (i32, i32) {
    %c0_i32 = arith.constant 0 : i32
    %c0_i32_0 = arith.constant 0 : i32
    %c0_i32_1 = arith.constant 0 : i32
    return %c0_i32, %c0_i32_0 : i32, i32
  }
  func.func @transform_4(%arg0: i32) -> (i32, i32) {
    %c0_i32 = arith.constant 0 : i32
    %c0_i32_0 = arith.constant 0 : i32
    return %c0_i32, %arg0 : i32, i32
  }
}

</mosaic_0001>

<bundles_post_ra>
// kernel: attentive_pooling.1
= control target key start
LH: loop header
LB: loop body
LE: loop exit
PB: predicated region body
PF: predicated region fallthrough
CT: control target
= control target key end

     0   :  { %s2498_s15 = smov 0   ;;  %s2500_s16 = smov 0   ;;  %s3561_s0 = inlined_call_operand.vmem [shape: f32[128,2048], index: 0, kind: input, shape index: {}]   ;;  %s3562_s1 = inlined_call_operand.vmem [shape: f32[128,128], index: 1, kind: input, shape index: {}]   ;;  %s3563_s2 = inlined_call_operand.vmem [shape: f32[16,8], index: 2, kind: input, shape index: {}]   ;;  %s3564_s3 = inlined_call_operand.vmem [shape: f32[16,1], index: 3, kind: input, shape index: {}]   ;;  %s3565_s4 = inlined_call_operand.vmem [shape: f32[16,2048], index: 4, kind: output, shape index: {}]  }
   0x1   :  { %s2502_s17 = smov 0  }
   0x2 LB: > { %s2093_s18 = sadd.s32 4294967295, %s2469_s17   ;;  %s2515_s19 = sadd.s32 1, %s2469_s17   ;;  %s2469_s17 = sphi %s2502_s17, %s3683_s17   ;;  %s2465_s16 = sphi %s2500_s16, %s3682_s16   ;;  %s2461_s15 = sphi %s2498_s15, %s3681_s15  }
   0x3   : > { %s18_s20 = ssub.s32 %s2469_s17, %s2515_s19  ;;  %s21_s21 = sadd.s32 1, %s2465_s16 }
   0x4   : > { %p19_p0 = scmp.eq.s32.totalorder %s18_s20, 0  ;;  %p28_p1 = scmp.ne.s32.totalorder %s2465_s16, %s2461_s15 }
   0x5   : > { %p29_p2 = scmp.eq.s32.totalorder %s2469_s17, 0  ;;  %p121_p3 = scmp.eq.s32.totalorder %s2093_s18, 3 }
   0x6   : > { %s2526_s22 = scalar_select %p19_p0, %s2465_s16, %s21_s21  }
   0x7   : > { %p30_p4 = por %p29_p2, %p28_p1  ;;  %p2528_p5 = por %p121_p3, %p28_p1 }
   0x8   : > { %p2096_p6 = scmp.ge.s32.totalorder %s2469_s17, 4 }
   0xa   : > { %152 = sbr.rel (%p2096_p6) target bundleno = 53 (0x35), region = 28 }
  0x11   : > { %155 = sbr.rel (!%p30_p4) target bundleno = 53 (0x35), region = 32  ;;  %s157_s24 = sand.u32 (%p30_p4), 1, %s2465_s16  }
  0x12   : > { %s2112_s25 = sshll.u32 (%p30_p4), %s2469_s17, 5  ;;  %s2097_s26 = sshll.u32 (%p30_p4), %s157_s24, 9 }
  0x13   : > { %s2538_s29 = scalar_lea.vmem (%p30_p4), %s3561_s0, %s2112_s25  ;;  %s2543_s30 = scalar_lea.vmem (%p30_p4), [#allocation2], %s2097_s26 }
  0x14   : > { %v175_v0 = vld [vmem:[%s2538_s29] sm:$0xff] (%p30_p4)  ;;  %v177_v1 = vld [vmem:[%s2538_s29 + $0x8] sm:$0xff] (%p30_p4)  ;;  %v179_v2 = vld [vmem:[%s2538_s29 + $0x10] sm:$0xff] (%p30_p4) }
  0x15   : > { %176 = vst [vmem:[%s2543_s30] sm:$0xff] (%p30_p4), %v175_v0  ;;  %178 = vst [vmem:[%s2543_s30 + $0x8] sm:$0xff] (%p30_p4), %v177_v1  ;;  %v181_v3 = vld [vmem:[%s2538_s29 + $0x18] sm:$0xff] (%p30_p4)  ;;  %v183_v4 = vld [vmem:[%s2538_s29 + $0x80] sm:$0xff] (%p30_p4) }
  0x16   : > { %180 = vst [vmem:[%s2543_s30 + $0x10] sm:$0xff] (%p30_p4), %v179_v2  ;;  %v185_v5 = vld [vmem:[%s2538_s29 + $0x88] sm:$0xff] (%p30_p4)  ;;  %182 = vst [vmem:[%s2543_s30 + $0x18] sm:$0xff] (%p30_p4), %v181_v3  ;;  %v187_v6 = vld [vmem:[%s2538_s29 + $0x90] sm:$0xff] (%p30_p4) }
  0x17   : > { %184 = vst [vmem:[%s2543_s30 + $0x20] sm:$0xff] (%p30_p4), %v183_v4  ;;  %186 = vst [vmem:[%s2543_s30 + $0x28] sm:$0xff] (%p30_p4), %v185_v5  ;;  %v189_v7 = vld [vmem:[%s2538_s29 + $0x98] sm:$0xff] (%p30_p4)  ;;  %v191_v8 = vld [vmem:[%s2538_s29 + $0x100] sm:$0xff] (%p30_p4) }
  0x18   : > { %188 = vst [vmem:[%s2543_s30 + $0x30] sm:$0xff] %v187_v6  ;;  %190 = vst [vmem:[%s2543_s30 + $0x38] sm:$0xff] %v189_v7  ;;  %v193_v9 = vld [vmem:[%s2538_s29 + $0x108] sm:$0xff]  ;;  %v195_v10 = vld [vmem:[%s2538_s29 + $0x110] sm:$0xff] }
  0x19   : > { %192 = vst [vmem:[%s2543_s30 + $0x40] sm:$0xff] %v191_v8  ;;  %v197_v11 = vld [vmem:[%s2538_s29 + $0x118] sm:$0xff]  ;;  %194 = vst [vmem:[%s2543_s30 + $0x48] sm:$0xff] %v193_v9  ;;  %v199_v12 = vld [vmem:[%s2538_s29 + $0x180] sm:$0xff] }
  0x1a   : > { %196 = vst [vmem:[%s2543_s30 + $0x50] sm:$0xff] %v195_v10  ;;  %198 = vst [vmem:[%s2543_s30 + $0x58] sm:$0xff] %v197_v11  ;;  %v201_v13 = vld [vmem:[%s2538_s29 + $0x188] sm:$0xff]  ;;  %v203_v14 = vld [vmem:[%s2538_s29 + $0x190] sm:$0xff] }
  0x1b   : > { %200 = vst [vmem:[%s2543_s30 + $0x60] sm:$0xff] %v199_v12  ;;  %202 = vst [vmem:[%s2543_s30 + $0x68] sm:$0xff] %v201_v13  ;;  %v205_v15 = vld [vmem:[%s2538_s29 + $0x198] sm:$0xff]  ;;  %v207_v16 = vld [vmem:[%s2538_s29 + $0x200] sm:$0xff] }
  0x1c   : > { %204 = vst [vmem:[%s2543_s30 + $0x70] sm:$0xff] %v203_v14  ;;  %v209_v17 = vld [vmem:[%s2538_s29 + $0x208] sm:$0xff]  ;;  %206 = vst [vmem:[%s2543_s30 + $0x78] sm:$0xff] %v205_v15  ;;  %v211_v18 = vld [vmem:[%s2538_s29 + $0x210] sm:$0xff] }
  0x1d   : > { %208 = vst [vmem:[%s2543_s30 + $0x80] sm:$0xff] %v207_v16  ;;  %210 = vst [vmem:[%s2543_s30 + $0x88] sm:$0xff] %v209_v17  ;;  %v213_v19 = vld [vmem:[%s2538_s29 + $0x218] sm:$0xff]  ;;  %v215_v20 = vld [vmem:[%s2538_s29 + $0x280] sm:$0xff] }
  0x1e   : > { %212 = vst [vmem:[%s2543_s30 + $0x90] sm:$0xff] %v211_v18  ;;  %214 = vst [vmem:[%s2543_s30 + $0x98] sm:$0xff] %v213_v19  ;;  %v217_v21 = vld [vmem:[%s2538_s29 + $0x288] sm:$0xff]  ;;  %v219_v22 = vld [vmem:[%s2538_s29 + $0x290] sm:$0xff] }
  0x1f   : > { %216 = vst [vmem:[%s2543_s30 + $0xa0] sm:$0xff] %v215_v20  ;;  %v221_v23 = vld [vmem:[%s2538_s29 + $0x298] sm:$0xff]  ;;  %218 = vst [vmem:[%s2543_s30 + $0xa8] sm:$0xff] %v217_v21  ;;  %v223_v24 = vld [vmem:[%s2538_s29 + $0x300] sm:$0xff] }
  0x20   : > { %220 = vst [vmem:[%s2543_s30 + $0xb0] sm:$0xff] %v219_v22  ;;  %222 = vst [vmem:[%s2543_s30 + $0xb8] sm:$0xff] %v221_v23  ;;  %v225_v25 = vld [vmem:[%s2538_s29 + $0x308] sm:$0xff]  ;;  %v227_v26 = vld [vmem:[%s2538_s29 + $0x310] sm:$0xff] }
  0x21   : > { %224 = vst [vmem:[%s2543_s30 + $0xc0] sm:$0xff] %v223_v24  ;;  %226 = vst [vmem:[%s2543_s30 + $0xc8] sm:$0xff] %v225_v25  ;;  %v229_v27 = vld [vmem:[%s2538_s29 + $0x318] sm:$0xff]  ;;  %v231_v28 = vld [vmem:[%s2538_s29 + $0x380] sm:$0xff] }
  0x22   : > { %228 = vst [vmem:[%s2543_s30 + $0xd0] sm:$0xff] %v227_v26  ;;  %v233_v29 = vld [vmem:[%s2538_s29 + $0x388] sm:$0xff]  ;;  %230 = vst [vmem:[%s2543_s30 + $0xd8] sm:$0xff] %v229_v27  ;;  %v235_v30 = vld [vmem:[%s2538_s29 + $0x390] sm:$0xff] }
  0x23   : > { %232 = vst [vmem:[%s2543_s30 + $0xe0] sm:$0xff] %v231_v28  ;;  %234 = vst [vmem:[%s2543_s30 + $0xe8] sm:$0xff] %v233_v29  ;;  %v237_v31 = vld [vmem:[%s2538_s29 + $0x398] sm:$0xff]  ;;  %v239_v32 = vld [vmem:[%s2538_s29 + $0x400] sm:$0xff] }
  0x24   : > { %236 = vst [vmem:[%s2543_s30 + $0xf0] sm:$0xff] %v235_v30  ;;  %238 = vst [vmem:[%s2543_s30 + $0xf8] sm:$0xff] %v237_v31  ;;  %v241_v33 = vld [vmem:[%s2538_s29 + $0x408] sm:$0xff]  ;;  %v243_v34 = vld [vmem:[%s2538_s29 + $0x410] sm:$0xff] }
  0x25   : > { %240 = vst [vmem:[%s2543_s30 + $0x100] sm:$0xff] %v239_v32  ;;  %v245_v35 = vld [vmem:[%s2538_s29 + $0x418] sm:$0xff]  ;;  %242 = vst [vmem:[%s2543_s30 + $0x108] sm:$0xff] %v241_v33  ;;  %v247_v36 = vld [vmem:[%s2538_s29 + $0x480] sm:$0xff] }
  0x26   : > { %244 = vst [vmem:[%s2543_s30 + $0x110] sm:$0xff] %v243_v34  ;;  %246 = vst [vmem:[%s2543_s30 + $0x118] sm:$0xff] %v245_v35  ;;  %v249_v37 = vld [vmem:[%s2538_s29 + $0x488] sm:$0xff]  ;;  %v251_v38 = vld [vmem:[%s2538_s29 + $0x490] sm:$0xff] }
  0x27   : > { %248 = vst [vmem:[%s2543_s30 + $0x120] sm:$0xff] %v247_v36  ;;  %250 = vst [vmem:[%s2543_s30 + $0x128] sm:$0xff] %v249_v37  ;;  %v253_v39 = vld [vmem:[%s2538_s29 + $0x498] sm:$0xff]  ;;  %v255_v40 = vld [vmem:[%s2538_s29 + $0x500] sm:$0xff] }
  0x28   : > { %252 = vst [vmem:[%s2543_s30 + $0x130] sm:$0xff] %v251_v38  ;;  %v257_v41 = vld [vmem:[%s2538_s29 + $0x508] sm:$0xff]  ;;  %254 = vst [vmem:[%s2543_s30 + $0x138] sm:$0xff] %v253_v39  ;;  %v259_v42 = vld [vmem:[%s2538_s29 + $0x510] sm:$0xff] }
  0x29   : > { %256 = vst [vmem:[%s2543_s30 + $0x140] sm:$0xff] %v255_v40  ;;  %258 = vst [vmem:[%s2543_s30 + $0x148] sm:$0xff] %v257_v41  ;;  %v261_v43 = vld [vmem:[%s2538_s29 + $0x518] sm:$0xff]  ;;  %v263_v44 = vld [vmem:[%s2538_s29 + $0x580] sm:$0xff] }
  0x2a   : > { %260 = vst [vmem:[%s2543_s30 + $0x150] sm:$0xff] %v259_v42  ;;  %262 = vst [vmem:[%s2543_s30 + $0x158] sm:$0xff] %v261_v43  ;;  %v265_v45 = vld [vmem:[%s2538_s29 + $0x588] sm:$0xff]  ;;  %v267_v46 = vld [vmem:[%s2538_s29 + $0x590] sm:$0xff] }
  0x2b   : > { %264 = vst [vmem:[%s2543_s30 + $0x160] sm:$0xff] %v263_v44  ;;  %v269_v47 = vld [vmem:[%s2538_s29 + $0x598] sm:$0xff]  ;;  %266 = vst [vmem:[%s2543_s30 + $0x168] sm:$0xff] %v265_v45  ;;  %v271_v48 = vld [vmem:[%s2538_s29 + $0x600] sm:$0xff] }
  0x2c   : > { %268 = vst [vmem:[%s2543_s30 + $0x170] sm:$0xff] %v267_v46  ;;  %270 = vst [vmem:[%s2543_s30 + $0x178] sm:$0xff] %v269_v47  ;;  %v273_v49 = vld [vmem:[%s2538_s29 + $0x608] sm:$0xff]  ;;  %v275_v50 = vld [vmem:[%s2538_s29 + $0x610] sm:$0xff] }
  0x2d   : > { %272 = vst [vmem:[%s2543_s30 + $0x180] sm:$0xff] %v271_v48  ;;  %274 = vst [vmem:[%s2543_s30 + $0x188] sm:$0xff] %v273_v49  ;;  %v277_v51 = vld [vmem:[%s2538_s29 + $0x618] sm:$0xff]  ;;  %v279_v52 = vld [vmem:[%s2538_s29 + $0x680] sm:$0xff] }
  0x2e   : > { %276 = vst [vmem:[%s2543_s30 + $0x190] sm:$0xff] %v275_v50  ;;  %v281_v53 = vld [vmem:[%s2538_s29 + $0x688] sm:$0xff]  ;;  %278 = vst [vmem:[%s2543_s30 + $0x198] sm:$0xff] %v277_v51  ;;  %v283_v54 = vld [vmem:[%s2538_s29 + $0x690] sm:$0xff] }
  0x2f   : > { %280 = vst [vmem:[%s2543_s30 + $0x1a0] sm:$0xff] %v279_v52  ;;  %282 = vst [vmem:[%s2543_s30 + $0x1a8] sm:$0xff] %v281_v53  ;;  %v285_v55 = vld [vmem:[%s2538_s29 + $0x698] sm:$0xff]  ;;  %v287_v56 = vld [vmem:[%s2538_s29 + $0x700] sm:$0xff] }
  0x30   : > { %284 = vst [vmem:[%s2543_s30 + $0x1b0] sm:$0xff] %v283_v54  ;;  %286 = vst [vmem:[%s2543_s30 + $0x1b8] sm:$0xff] %v285_v55  ;;  %v289_v57 = vld [vmem:[%s2538_s29 + $0x708] sm:$0xff]  ;;  %v291_v58 = vld [vmem:[%s2538_s29 + $0x710] sm:$0xff] }
  0x31   : > { %288 = vst [vmem:[%s2543_s30 + $0x1c0] sm:$0xff] %v287_v56  ;;  %v293_v59 = vld [vmem:[%s2538_s29 + $0x718] sm:$0xff]  ;;  %290 = vst [vmem:[%s2543_s30 + $0x1c8] sm:$0xff] %v289_v57  ;;  %v295_v60 = vld [vmem:[%s2538_s29 + $0x780] sm:$0xff] }
  0x32   : > { %292 = vst [vmem:[%s2543_s30 + $0x1d0] sm:$0xff] %v291_v58  ;;  %294 = vst [vmem:[%s2543_s30 + $0x1d8] sm:$0xff] %v293_v59  ;;  %v297_v61 = vld [vmem:[%s2538_s29 + $0x788] sm:$0xff]  ;;  %v299_v62 = vld [vmem:[%s2538_s29 + $0x790] sm:$0xff] }
  0x33   : > { %296 = vst [vmem:[%s2543_s30 + $0x1e0] sm:$0xff] %v295_v60  ;;  %298 = vst [vmem:[%s2543_s30 + $0x1e8] sm:$0xff] %v297_v61  ;;  %v301_v63 = vld [vmem:[%s2538_s29 + $0x798] sm:$0xff] }
  0x34   : > { %300 = vst [vmem:[%s2543_s30 + $0x1f0] sm:$0xff] %v299_v62  ;;  %302 = vst [vmem:[%s2543_s30 + $0x1f8] sm:$0xff] %v301_v63 }
  0x35 PF: > { %p2100_p7 = scmp.ge.s32.totalorder %s2469_s17, 1  ;;  %p307_p8 = scmp.lt.s32.totalorder %s2469_s17, 5 }
  0x37   : > { %p308_p9 = pnand %p2100_p7, %p307_p8 }
  0x39   : > { %311 = sbr.rel (%p308_p9) target bundleno = 818 (0x332), region = 55 }
  0x40   : > { %s314_s5 = sand.u32 1, %s2461_s15   ;;  %v3566_v0 = vmov 0.0   ;;  %vm1780_vm0 = vcmask 1041409   ;;  %vm1782_vm1 = vcmask 1042434   ;;  %vm1784_vm2 = vcmask 1043459   ;;  %s2113_s15 = sshll.u32 (%p2528_p5), %s2093_s18, 5 }
  0x41   : > { %s2101_s6 = sshll.u32 %s314_s5, 9  ;;  %484 = vmatprep.mubr.f32.mxu0 %v3566_v0  ;;  %645 = vmatprep.mubr.f32.mxu1 %v3566_v0  ;;  %vm1786_vm3 = vcmask 1044484   ;;  %vm1788_vm4 = vcmask 1045509   ;;  %vm1790_vm5 = vcmask 1046534   ;;  %vm1792_vm6 = vcmask 1047559   ;;  %s2102_s13 = sshll.u32 %s314_s5, 6 }
  0x42   : > { %s2677_s7 = scalar_lea.vmem [#allocation2], %s2101_s6  ;;  %vm1819_vm7 = vcmask 64512   ;;  %s3526_s14 = scalar_lea.vmem [#allocation3], %s2102_s13 }
  0x43   : > { %v2680_v1 = vld [vmem:[%s2677_s7 + $0x8] sm:$0xff]  ;;  %v2686_v3 = vld [vmem:[%s2677_s7 + $0x18] sm:$0xff]  ;;  %v2694_v6 = vld [vmem:[%s2677_s7] sm:$0xff]  ;;  %s2005_s21 = scalar_lea.vmem (%p2528_p5), %s3565_s4, %s2113_s15 }
  0x44   : > { %v2683_v2 = vld [vmem:[%s2677_s7 + $0x28] sm:$0xff]  ;;  %v2691_v5 = vld [vmem:[%s2677_s7 + $0x38] sm:$0xff]  ;;  %v2697_v7 = vld [vmem:[%s2677_s7 + $0x20] sm:$0xff] }
  0x45   : > { %v2114_v4 = vpack.c.bf16 %v2683_v2, %v2680_v1  ;;  %v2146_v8 = vpack.c.bf16 %v2691_v5, %v2686_v3  ;;  %v2116_v9 = vpack.c.bf16 %v2697_v7, %v2694_v6  ;;  %v2704_v10 = vld [vmem:[%s2677_s7 + $0x10] sm:$0xff]  ;;  %v2710_v12 = vld [vmem:[%s2677_s7 + $0x48] sm:$0xff]  ;;  %v351_v15 = vld [vmem:[%s2677_s7 + $0x58] sm:$0xff] }
  0x46   : > { %v2707_v11 = vld [vmem:[%s2677_s7 + $0x30] sm:$0xff]  ;;  %v2715_v14 = vld [vmem:[%s2677_s7 + $0x68] sm:$0xff]  ;;  %v355_v16 = vld [vmem:[%s2677_s7 + $0x78] sm:$0xff] }
  0x47   : > { %2115 = vmatprep.subr.bf16.mxu0 %v2114_v4  ;;  %v2148_v13 = vpack.c.bf16 %v2707_v11, %v2704_v10  ;;  %2147 = vmatprep.subr.bf16.mxu1 %v2146_v8  ;;  %v2118_v17 = vpack.c.bf16 %v2715_v14, %v2710_v12  ;;  %v2150_v18 = vpack.c.bf16 %v355_v16, %v351_v15  ;;  %v2722_v19 = vld [vmem:[%s2677_s7 + $0x40] sm:$0xff]  ;;  %v2728_v21 = vld [vmem:[%s2677_s7 + $0x50] sm:$0xff]  ;;  %v357_v24 = vld [vmem:[%s2677_s7 + $0x88] sm:$0xff] }
  0x48   : > { %2117 = vmatpush1.bf16.msra.mxu0 %v2116_v9  ;;  %v2725_v20 = vld [vmem:[%s2677_s7 + $0x60] sm:$0xff]  ;;  %v2733_v23 = vld [vmem:[%s2677_s7 + $0x70] sm:$0xff]  ;;  %v361_v25 = vld [vmem:[%s2677_s7 + $0xa8] sm:$0xff] }
  0x49   : > { %2149 = vmatpush1.bf16.msra.mxu1 %v2148_v13  ;;  %v2120_v22 = vpack.c.bf16 %v2725_v20, %v2722_v19  ;;  %2119 = vmatprep.subr.bf16.mxu0 %v2118_v17  ;;  %v2152_v26 = vpack.c.bf16 %v2733_v23, %v2728_v21  ;;  %v2122_v27 = vpack.c.bf16 %v361_v25, %v357_v24  ;;  %v359_v28 = vld [vmem:[%s2677_s7 + $0x98] sm:$0xff]  ;;  %v356_v30 = vld [vmem:[%s2677_s7 + $0x80] sm:$0xff]  ;;  %v358_v33 = vld [vmem:[%s2677_s7 + $0x90] sm:$0xff] }
  0x4a   : > { %2151 = vmatprep.subr.bf16.mxu1 %v2150_v18  ;;  %v363_v29 = vld [vmem:[%s2677_s7 + $0xb8] sm:$0xff]  ;;  %v360_v32 = vld [vmem:[%s2677_s7 + $0xa0] sm:$0xff]  ;;  %v362_v34 = vld [vmem:[%s2677_s7 + $0xb0] sm:$0xff] }
  0x4b   : > { %v2154_v31 = vpack.c.bf16 %v363_v29, %v359_v28  ;;  %v2124_v35 = vpack.c.bf16 %v360_v32, %v356_v30  ;;  %v365_v36 = vld [vmem:[%s2677_s7 + $0xc8] sm:$0xff]  ;;  %v367_v38 = vld [vmem:[%s2677_s7 + $0xd8] sm:$0xff]  ;;  %v2156_v39 = vpack.c.bf16 %v362_v34, %v358_v33  ;;  %v364_v42 = vld [vmem:[%s2677_s7 + $0xc0] sm:$0xff] }
  0x4c   : > { %2121 = vmatpush1.bf16.msra.mxu0 %v2120_v22  ;;  %v369_v37 = vld [vmem:[%s2677_s7 + $0xe8] sm:$0xff]  ;;  %v371_v41 = vld [vmem:[%s2677_s7 + $0xf8] sm:$0xff]  ;;  %v368_v43 = vld [vmem:[%s2677_s7 + $0xe0] sm:$0xff] }
  0x4d   : > { %2153 = vmatpush1.bf16.msra.mxu1 %v2152_v26  ;;  %2123 = vmatprep.subr.bf16.mxu0 %v2122_v27  ;;  %v2126_v40 = vpack.c.bf16 %v369_v37, %v365_v36  ;;  %v2158_v44 = vpack.c.bf16 %v371_v41, %v367_v38  ;;  %v366_v45 = vld [vmem:[%s2677_s7 + $0xd0] sm:$0xff]  ;;  %v373_v47 = vld [vmem:[%s2677_s7 + $0x108] sm:$0xff]  ;;  %v375_v49 = vld [vmem:[%s2677_s7 + $0x118] sm:$0xff]  ;;  %v2128_v51 = vpack.c.bf16 %v368_v43, %v364_v42 }
  0x4e   : > { %2155 = vmatprep.subr.bf16.mxu1 %v2154_v31  ;;  %v370_v46 = vld [vmem:[%s2677_s7 + $0xf0] sm:$0xff]  ;;  %v377_v48 = vld [vmem:[%s2677_s7 + $0x128] sm:$0xff]  ;;  %v379_v50 = vld [vmem:[%s2677_s7 + $0x138] sm:$0xff] }
  0x4f   : > { %v2160_v52 = vpack.c.bf16 %v370_v46, %v366_v45  ;;  %v2130_v53 = vpack.c.bf16 %v377_v48, %v373_v47  ;;  %v372_v54 = vld [vmem:[%s2677_s7 + $0x100] sm:$0xff]  ;;  %v374_v56 = vld [vmem:[%s2677_s7 + $0x110] sm:$0xff]  ;;  %v2162_v57 = vpack.c.bf16 %v379_v50, %v375_v49  ;;  %v381_v59 = vld [vmem:[%s2677_s7 + $0x148] sm:$0xff] }
  0x50   : > { %2125 = vmatpush1.bf16.msra.mxu0 %v2124_v35  ;;  %v376_v55 = vld [vmem:[%s2677_s7 + $0x120] sm:$0xff]  ;;  %v378_v58 = vld [vmem:[%s2677_s7 + $0x130] sm:$0xff]  ;;  %v385_v60 = vld [vmem:[%s2677_s7 + $0x168] sm:$0xff] }
  0x51   : > { %2157 = vmatpush1.bf16.msra.mxu1 %v2156_v39  ;;  %2127 = vmatprep.subr.bf16.mxu0 %v2126_v40  ;;  %v383_v61 = vld [vmem:[%s2677_s7 + $0x158] sm:$0xff]  ;;  %v2132_v63 = vpack.c.bf16 %v376_v55, %v372_v54  ;;  %v2164_v4 = vpack.c.bf16 %v378_v58, %v374_v56  ;;  %v2134_v8 = vpack.c.bf16 %v385_v60, %v381_v59  ;;  %v380_v9 = vld [vmem:[%s2677_s7 + $0x140] sm:$0xff]  ;;  %v382_v15 = vld [vmem:[%s2677_s7 + $0x150] sm:$0xff] }
  0x52   : > { %2159 = vmatprep.subr.bf16.mxu1 %v2158_v44  ;;  %v387_v62 = vld [vmem:[%s2677_s7 + $0x178] sm:$0xff]  ;;  %v384_v13 = vld [vmem:[%s2677_s7 + $0x160] sm:$0xff]  ;;  %v386_v17 = vld [vmem:[%s2677_s7 + $0x170] sm:$0xff] }
  0x53   : > { %v2166_v16 = vpack.c.bf16 %v387_v62, %v383_v61  ;;  %v389_v18 = vld [vmem:[%s2677_s7 + $0x188] sm:$0xff]  ;;  %v391_v24 = vld [vmem:[%s2677_s7 + $0x198] sm:$0xff]  ;;  %v2136_v26 = vpack.c.bf16 %v384_v13, %v380_v9  ;;  %v2168_v27 = vpack.c.bf16 %v386_v17, %v382_v15  ;;  %v388_v29 = vld [vmem:[%s2677_s7 + $0x180] sm:$0xff] }
  0x54   : > { %2129 = vmatpush1.bf16.msra.mxu0 %v2128_v51  ;;  %v393_v22 = vld [vmem:[%s2677_s7 + $0x1a8] sm:$0xff]  ;;  %v395_v25 = vld [vmem:[%s2677_s7 + $0x1b8] sm:$0xff]  ;;  %v392_v30 = vld [vmem:[%s2677_s7 + $0x1a0] sm:$0xff] }
  0x55   : > { %2161 = vmatpush1.bf16.msra.mxu1 %v2160_v52  ;;  %2131 = vmatprep.subr.bf16.mxu0 %v2130_v53  ;;  %v2138_v28 = vpack.c.bf16 %v393_v22, %v389_v18  ;;  %v390_v31 = vld [vmem:[%s2677_s7 + $0x190] sm:$0xff]  ;;  %v2170_v32 = vpack.c.bf16 %v395_v25, %v391_v24  ;;  %v397_v34 = vld [vmem:[%s2677_s7 + $0x1c8] sm:$0xff]  ;;  %v399_v36 = vld [vmem:[%s2677_s7 + $0x1d8] sm:$0xff]  ;;  %v2140_v38 = vpack.c.bf16 %v392_v30, %v388_v29 }
  0x56   : > { %2163 = vmatprep.subr.bf16.mxu1 %v2162_v57  ;;  %v394_v33 = vld [vmem:[%s2677_s7 + $0x1b0] sm:$0xff]  ;;  %v401_v35 = vld [vmem:[%s2677_s7 + $0x1e8] sm:$0xff]  ;;  %v403_v37 = vld [vmem:[%s2677_s7 + $0x1f8] sm:$0xff] }
  0x57   : > { %v2172_v39 = vpack.c.bf16 %v394_v33, %v390_v31  ;;  %v2142_v40 = vpack.c.bf16 %v401_v35, %v397_v34  ;;  %v396_v41 = vld [vmem:[%s2677_s7 + $0x1c0] sm:$0xff]  ;;  %v2174_v43 = vpack.c.bf16 %v403_v37, %v399_v36  ;;  %v398_v44 = vld [vmem:[%s2677_s7 + $0x1d0] sm:$0xff]  ;;  %v405_v49 = vld [vmem:[%s3562_s1 + $0x8] sm:$0xff] }
  0x58   : > { %2133 = vmatpush1.bf16.msra.mxu0 %v2132_v63  ;;  %v400_v42 = vld [vmem:[%s2677_s7 + $0x1e0] sm:$0xff]  ;;  %v402_v45 = vld [vmem:[%s2677_s7 + $0x1f0] sm:$0xff]  ;;  %v407_v51 = vld [vmem:[%s3562_s1 + $0x18] sm:$0xff] }
  0x59   : > { %2165 = vmatpush1.bf16.msra.mxu1 %v2164_v4  ;;  %2135 = vmatprep.subr.bf16.mxu0 %v2134_v8  ;;  %v2144_v46 = vpack.c.bf16 %v400_v42, %v396_v41  ;;  %v2176_v47 = vpack.c.bf16 %v402_v45, %v398_v44  ;;  %v404_v48 = vld [vmem:[%s3562_s1] sm:$0xff]  ;;  %v406_v50 = vld [vmem:[%s3562_s1 + $0x10] sm:$0xff]  ;;  %v409_v53 = vld [vmem:[%s3562_s1 + $0x28] sm:$0xff] }
  0x5a   : > { %2167 = vmatprep.subr.bf16.mxu1 %v2166_v16  ;;  %v408_v52 = vld [vmem:[%s3562_s1 + $0x20] sm:$0xff]  ;;  %v410_v54 = vld [vmem:[%s3562_s1 + $0x30] sm:$0xff]  ;;  %v411_v55 = vld [vmem:[%s3562_s1 + $0x38] sm:$0xff] }
  0x5b   : > { %v412_v56 = vld [vmem:[%s3562_s1 + $0x40] sm:$0xff]  ;;  %v413_v57 = vld [vmem:[%s3562_s1 + $0x48] sm:$0xff]  ;;  %v414_v58 = vld [vmem:[%s3562_s1 + $0x50] sm:$0xff] }
  0x5c   : > { %2137 = vmatpush1.bf16.msra.mxu0 %v2136_v26  ;;  %v415_v59 = vld [vmem:[%s3562_s1 + $0x58] sm:$0xff]  ;;  %v416_v60 = vld [vmem:[%s3562_s1 + $0x60] sm:$0xff]  ;;  %v417_v61 = vld [vmem:[%s3562_s1 + $0x68] sm:$0xff] }
  0x5d   : > { %2169 = vmatpush1.bf16.msra.mxu1 %v2168_v27  ;;  %2139 = vmatprep.subr.bf16.mxu0 %v2138_v28  ;;  %v418_v62 = vld [vmem:[%s3562_s1 + $0x70] sm:$0xff]  ;;  %v419_v63 = vld [vmem:[%s3562_s1 + $0x78] sm:$0xff] }
  0x5e   : > { %2171 = vmatprep.subr.bf16.mxu1 %v2170_v32 }
  0x60   : > { %2141 = vmatpush1.bf16.msra.mxu0 %v2140_v38 }
  0x61   : > { %2173 = vmatpush1.bf16.msra.mxu1 %v2172_v39  ;;  %2143 = vmatprep.subr.bf16.mxu0 %v2142_v40 }
  0x62   : > { %2175 = vmatprep.subr.bf16.mxu1 %v2174_v43 }
  0x64   : > { %2145 = vmatpush1.bf16.msra.mxu0 %v2144_v46 }
  0x65   : > { %2177 = vmatpush1.bf16.msra.mxu1 %v2176_v47 }
  0x67   : > { %485 = vmatmul.mubr.f32.vlgmr.msra.gmra.mrb[0].mxu0 %v404_v48 }
  0x68   : > { %646 = vmatmul.mubr.f32.vlgmr.msra.gmra.mrb[0].mxu1 %v404_v48  ;;  %490 = vmatprep.mubr.f32.mxu0 %v3566_v0 }
  0x69   : > { %651 = vmatprep.mubr.f32.mxu1 %v3566_v0 }
  0x6b   : > { %491 = vmatmul.mubr.f32.gmra.mrb[2].mxu0 %v405_v49 }
  0x6c   : > { %652 = vmatmul.mubr.f32.gmra.mrb[2].mxu1 %v405_v49  ;;  %496 = vmatprep.mubr.f32.mxu0 %v3566_v0 }
  0x6d   : > { %657 = vmatprep.mubr.f32.mxu1 %v3566_v0 }
  0x6f   : > { %497 = vmatmul.mubr.f32.gmra.mrb[4].mxu0 %v406_v50 }
  0x70   : > { %658 = vmatmul.mubr.f32.gmra.mrb[4].mxu1 %v406_v50  ;;  %502 = vmatprep.mubr.f32.mxu0 %v3566_v0 }
  0x71   : > { %663 = vmatprep.mubr.f32.mxu1 %v3566_v0 }
  0x73   : > { %503 = vmatmul.mubr.f32.gmra.mrb[6].mxu0 %v407_v51 }
  0x74   : > { %664 = vmatmul.mubr.f32.gmra.mrb[6].mxu1 %v407_v51  ;;  %508 = vmatprep.mubr.f32.mxu0 %v3566_v0 }
  0x75   : > { %669 = vmatprep.mubr.f32.mxu1 %v3566_v0 }
  0x77   : > { %509 = vmatmul.mubr.f32.gmra.mrb[8].mxu0 %v408_v52 }
  0x78   : > { %670 = vmatmul.mubr.f32.gmra.mrb[8].mxu1 %v408_v52  ;;  %514 = vmatprep.mubr.f32.mxu0 %v3566_v0 }
  0x79   : > { %675 = vmatprep.mubr.f32.mxu1 %v3566_v0 }
  0x7b   : > { %515 = vmatmul.mubr.f32.gmra.mrb[10].mxu0 %v409_v53 }
  0x7c   : > { %676 = vmatmul.mubr.f32.gmra.mrb[10].mxu1 %v409_v53  ;;  %520 = vmatprep.mubr.f32.mxu0 %v3566_v0 }
  0x7d   : > { %681 = vmatprep.mubr.f32.mxu1 %v3566_v0 }
  0x7f   : > { %521 = vmatmul.mubr.f32.gmra.mrb[12].mxu0 %v410_v54 }
  0x80   : > { %682 = vmatmul.mubr.f32.gmra.mrb[12].mxu1 %v410_v54  ;;  %526 = vmatprep.mubr.f32.mxu0 %v3566_v0 }
  0x81   : > { %687 = vmatprep.mubr.f32.mxu1 %v3566_v0 }
  0x83   : > { %527 = vmatmul.mubr.f32.gmra.mrb[14].mxu0 %v411_v55 }
  0x84   : > { %688 = vmatmul.mubr.f32.gmra.mrb[14].mxu1 %v411_v55  ;;  %532 = vmatprep.mubr.f32.mxu0 %v3566_v0 }
  0x85   : > { %693 = vmatprep.mubr.f32.mxu1 %v3566_v0 }
  0x87   : > { %533 = vmatmul.mubr.f32.gmra.mrb[16].mxu0 %v412_v56 }
  0x88   : > { %694 = vmatmul.mubr.f32.gmra.mrb[16].mxu1 %v412_v56  ;;  %538 = vmatprep.mubr.f32.mxu0 %v3566_v0 }
  0x89   : > { %699 = vmatprep.mubr.f32.mxu1 %v3566_v0 }
  0x8b   : > { %539 = vmatmul.mubr.f32.gmra.mrb[18].mxu0 %v413_v57 }
  0x8c   : > { %700 = vmatmul.mubr.f32.gmra.mrb[18].mxu1 %v413_v57  ;;  %544 = vmatprep.mubr.f32.mxu0 %v3566_v0 }
  0x8d   : > { %705 = vmatprep.mubr.f32.mxu1 %v3566_v0 }
  0x8f   : > { %545 = vmatmul.mubr.f32.gmra.mrb[20].mxu0 %v414_v58 }
  0x90   : > { %706 = vmatmul.mubr.f32.gmra.mrb[20].mxu1 %v414_v58  ;;  %550 = vmatprep.mubr.f32.mxu0 %v3566_v0 }
  0x91   : > { %711 = vmatprep.mubr.f32.mxu1 %v3566_v0 }
  0x93   : > { %551 = vmatmul.mubr.f32.gmra.mrb[22].mxu0 %v415_v59 }
  0x94   : > { %712 = vmatmul.mubr.f32.gmra.mrb[22].mxu1 %v415_v59  ;;  %556 = vmatprep.mubr.f32.mxu0 %v3566_v0 }
  0x95   : > { %717 = vmatprep.mubr.f32.mxu1 %v3566_v0 }
  0x97   : > { %557 = vmatmul.mubr.f32.gmra.mrb[24].mxu0 %v416_v60 }
  0x98   : > { %718 = vmatmul.mubr.f32.gmra.mrb[24].mxu1 %v416_v60  ;;  %562 = vmatprep.mubr.f32.mxu0 %v3566_v0 }
  0x99   : > { %723 = vmatprep.mubr.f32.mxu1 %v3566_v0 }
  0x9b   : > { %563 = vmatmul.mubr.f32.gmra.mrb[26].mxu0 %v417_v61 }
  0x9c   : > { %724 = vmatmul.mubr.f32.gmra.mrb[26].mxu1 %v417_v61  ;;  %568 = vmatprep.mubr.f32.mxu0 %v3566_v0 }
  0x9d   : > { %729 = vmatprep.mubr.f32.mxu1 %v3566_v0 }
  0x9f   : > { %569 = vmatmul.mubr.f32.gmra.mrb[28].mxu0 %v418_v62 }
  0xa0   : > { %730 = vmatmul.mubr.f32.gmra.mrb[28].mxu1 %v418_v62  ;;  %574 = vmatprep.mubr.f32.mxu0 %v3566_v0 }
  0xa1   : > { %735 = vmatprep.mubr.f32.mxu1 %v3566_v0 }
  0xa3   : > { %575 = vmatmul.mubr.f32.gmra.mrb[30].mxu0 %v419_v63 }
  0xa4   : > { %736 = vmatmul.mubr.f32.gmra.mrb[30].mxu1 %v419_v63  ;;  %1890 = vmatprep.mubr.f32.mxu0 %v3566_v0 }
  0xa5   : > { %1967 = vmatprep.mubr.f32.mxu1 %v3566_v0 }
 0x13a   : > { %v2865_v4 = vpop.f32.mrb[0].mxu0 }
 0x13b   : > { %v2867_v8 = vpop.f32.mrb[0].mxu1  ;;  %v2869_v9 = vpop.f32.mrb[1].mxu0 }
 0x13c   : > { %v2871_v13 = vpop.f32.mrb[1].mxu1 }
 0x13e   : > { %v2873_v15 = vpop.f32.mrb[2].mxu0 }
 0x13f   : > { %v742_v16 = vmax.f32 %v2865_v4, %v2873_v15  ;;  %v2877_v17 = vpop.f32.mrb[2].mxu1  ;;  %v2879_v18 = vpop.f32.mrb[3].mxu0 }
 0x140   : > { %v756_v22 = vmax.f32 %v2867_v8, %v2877_v17  ;;  %v749_v24 = vmax.f32 %v2869_v9, %v2879_v18  ;;  %v2885_v25 = vpop.f32.mrb[3].mxu1 }
 0x141   : > { %v743_v26 = vrot.slane %v742_v16, 4  ;;  %v763_v27 = vmax.f32 %v2871_v13, %v2885_v25 }
 0x142   : > { %v757_v28 = vrot.slane %v756_v22, 4  ;;  %v750_v29 = vrot.slane %v749_v24, 4  ;;  %v2889_v30 = vpop.f32.mrb[4].mxu0 }
 0x143   : > { %v744_v31 = vmax.f32 %v742_v16, %v743_v26  ;;  %v764_v32 = vrot.slane %v763_v27, 4  ;;  %v2891_v33 = vpop.f32.mrb[4].mxu1  ;;  %v2893_v34 = vpop.f32.mrb[5].mxu0 }
 0x144   : > { %v758_v35 = vmax.f32 %v756_v22, %v757_v28  ;;  %v751_v36 = vmax.f32 %v749_v24, %v750_v29  ;;  %v2895_v37 = vpop.f32.mrb[5].mxu1 }
 0x145   : > { %v745_v38 = vrot.slane %v744_v31, 2  ;;  %v765_v39 = vmax.f32 %v763_v27, %v764_v32 }
 0x146   : > { %v759_v40 = vrot.slane %v758_v35, 2  ;;  %v752_v41 = vrot.slane %v751_v36, 2  ;;  %v2897_v42 = vpop.f32.mrb[6].mxu0 }
 0x147   : > { %v746_v43 = vmax.f32 %v744_v31, %v745_v38  ;;  %v766_v44 = vrot.slane %v765_v39, 2  ;;  %v770_v45 = vmax.f32 %v2889_v30, %v2897_v42  ;;  %v2901_v46 = vpop.f32.mrb[6].mxu1  ;;  %v2903_v47 = vpop.f32.mrb[7].mxu0 }
 0x148   : > { %v760_v48 = vmax.f32 %v758_v35, %v759_v40  ;;  %v753_v49 = vmax.f32 %v751_v36, %v752_v41  ;;  %v784_v50 = vmax.f32 %v2891_v33, %v2901_v46  ;;  %v777_v51 = vmax.f32 %v2893_v34, %v2903_v47  ;;  %v2909_v52 = vpop.f32.mrb[7].mxu1 }
 0x149   : > { %v747_v53 = vrot.slane %v746_v43, 1  ;;  %v767_v54 = vmax.f32 %v765_v39, %v766_v44  ;;  %v771_v55 = vrot.slane %v770_v45, 4  ;;  %v791_v56 = vmax.f32 %v2895_v37, %v2909_v52 }
 0x14a   : > { %v761_v57 = vrot.slane %v760_v48, 1  ;;  %v754_v58 = vrot.slane %v753_v49, 1  ;;  %v785_v59 = vrot.slane %v784_v50, 4  ;;  %v778_v60 = vrot.slane %v777_v51, 4  ;;  %v2913_v61 = vpop.f32.mrb[8].mxu0 }
 0x14b   : > { %v748_v62 = vmax.f32 %v746_v43, %v747_v53  ;;  %v768_v63 = vrot.slane %v767_v54, 1  ;;  %v772_v16 = vmax.f32 %v770_v45, %v771_v55  ;;  %v792_v22 = vrot.slane %v791_v56, 4  ;;  %v2915_v24 = vpop.f32.mrb[8].mxu1  ;;  %v2917_v26 = vpop.f32.mrb[9].mxu0 }
 0x14c   : > { %v762_v27 = vmax.f32 %v760_v48, %v761_v57  ;;  %v755_v28 = vmax.f32 %v753_v49, %v754_v58  ;;  %v786_v29 = vmax.f32 %v784_v50, %v785_v59  ;;  %v779_v31 = vmax.f32 %v777_v51, %v778_v60  ;;  %v2919_v32 = vpop.f32.mrb[9].mxu1 }
 0x14d   : > { %v966_v35 = vsub.f32 %v2865_v4, %v748_v62  ;;  %v970_v36 = vsub.f32 %v2873_v15, %v748_v62  ;;  %v769_v38 = vmax.f32 %v767_v54, %v768_v63  ;;  %v773_v39 = vrot.slane %v772_v16, 2 }
 0x14e   : > { %v968_v40 = vsub.f32 %v2867_v8, %v762_v27  ;;  %v972_v41 = vsub.f32 %v2877_v17, %v762_v27  ;;  %v967_v43 = vsub.f32 %v2869_v9, %v755_v28  ;;  %v971_v44 = vsub.f32 %v2879_v18, %v755_v28  ;;  %v2927_v45 = vpop.f32.mrb[10].mxu0 }
 0x14f   : > { %v1030_v48 = vmul.f32 1.442695, %v966_v35  ;;  %v1038_v49 = vmul.f32 1.442695, %v970_v36  ;;  %v969_v50 = vsub.f32 %v2871_v13, %v769_v38  ;;  %v973_v4 = vsub.f32 %v2885_v25, %v769_v38  ;;  %v2931_v51 = vpop.f32.mrb[10].mxu1  ;;  %v2933_v15 = vpop.f32.mrb[11].mxu0 }
 0x150   : > { %v1034_v53 = vmul.f32 1.442695, %v968_v40  ;;  %v1042_v8 = vmul.f32 1.442695, %v972_v41  ;;  %v1032_v54 = vmul.f32 1.442695, %v967_v43  ;;  %v774_v17 = vmax.f32 %v772_v16, %v773_v39 }
 0x151   : > { %2205 = vpow2.f32 %v1030_v48  ;;  %v1040_v9 = vmul.f32 1.442695, %v971_v44  ;;  %v1036_v55 = vmul.f32 1.442695, %v969_v50  ;;  %v1044_v18 = vmul.f32 1.442695, %v973_v4 }
 0x152   : > { %2207 = vpow2.f32 %v1038_v49  ;;  %v775_v57 = vrot.slane %v774_v17, 1  ;;  %v787_v58 = vrot.slane %v786_v29, 2  ;;  %v780_v59 = vrot.slane %v779_v31, 2  ;;  %v2935_v60 = vpop.f32.mrb[11].mxu1  ;;  %v2937_v13 = vpop.f32.mrb[12].mxu0 }
 0x153   : > { %2209 = vpow2.f32 %v1034_v53  ;;  %v793_v25 = vmax.f32 %v791_v56, %v792_v22  ;;  %v798_v62 = vmax.f32 %v2913_v61, %v2927_v45  ;;  %v812_v63 = vmax.f32 %v2915_v24, %v2931_v51  ;;  %v2943_v16 = vpop.f32.mrb[12].mxu1  ;;  %v2945_v27 = vpop.f32.mrb[13].mxu0 }
 0x154   : > { %2211 = vpow2.f32 %v1042_v8  ;;  %v776_v28 = vmax.f32 %v774_v17, %v775_v57  ;;  %v788_v35 = vmax.f32 %v786_v29, %v787_v58  ;;  %v781_v36 = vmax.f32 %v779_v31, %v780_v59  ;;  %v2947_v38 = vpop.f32.mrb[13].mxu1 }
 0x155   : > { %2213 = vpow2.f32 %v1032_v54  ;;  %v794_v39 = vrot.slane %v793_v25, 2  ;;  %v799_v40 = vrot.slane %v798_v62, 4  ;;  %v813_v56 = vrot.slane %v812_v63, 4 }
 0x156   : > { %2215 = vpow2.f32 %v1040_v9  ;;  %v974_v22 = vsub.f32 %v2889_v30, %v776_v28  ;;  %v978_v41 = vsub.f32 %v2897_v42, %v776_v28  ;;  %v789_v43 = vrot.slane %v788_v35, 1  ;;  %v2951_v44 = vpop.f32.mrb[14].mxu0 }
 0x157   : > { %2217 = vpow2.f32 %v1036_v55  ;;  %v782_v48 = vrot.slane %v781_v36, 1  ;;  %v795_v49 = vmax.f32 %v793_v25, %v794_v39  ;;  %v800_v50 = vmax.f32 %v798_v62, %v799_v40  ;;  %v2953_v29 = vpop.f32.mrb[14].mxu1  ;;  %v2955_v31 = vpop.f32.mrb[15].mxu0 }
 0x158   : > { %2219 = vpow2.f32 %v1044_v18  ;;  %v1046_v4 = vmul.f32 1.442695, %v974_v22  ;;  %v1054_v53 = vmul.f32 1.442695, %v978_v41  ;;  %v790_v8 = vmax.f32 %v788_v35, %v789_v43  ;;  %v2957_v54 = vpop.f32.mrb[15].mxu1 }
 0x159   : > { %v783_v30 = vmax.f32 %v781_v36, %v782_v48  ;;  %v796_v17 = vrot.slane %v795_v49, 1  ;;  %v801_v42 = vrot.slane %v800_v50, 2  ;;  %v2961_v57 = vmax.f32 %v812_v63, %v813_v56 }
 0x15a   : > { %v976_v9 = vsub.f32 %v2891_v33, %v790_v8  ;;  %v980_v55 = vsub.f32 %v2901_v46, %v790_v8  ;;  %v2965_v58 = vmax.f32 %v2917_v26, %v2933_v15  ;;  %v2967_v59 = vpop.f32.mrb[16].mxu0  ;;  %2221 = vpow2.f32 %v1046_v4 }
 0x15b   : > { %v2206_v18 = vpop.eup %2205  ;;  %v975_v25 = vsub.f32 %v2893_v34, %v783_v30  ;;  %v979_v62 = vsub.f32 %v2903_v47, %v783_v30  ;;  %v2971_v28 = vmax.f32 %v795_v49, %v796_v17  ;;  %v2973_v35 = vpop.f32.mrb[16].mxu1  ;;  %2223 = vpow2.f32 %v1054_v53 }
 0x15c   : > { %3595 = vst [vmem:[#allocation4_spill] sm:$0xff] %v2973_v35  ;;  %v2975_v33 = vpop.f32.mrb[17].mxu0  ;;  %v2208_v46 = vpop.eup %2207  ;;  %v1382_v63 = vmul.f32 %v2206_v18, %v2694_v6  ;;  %v1050_v36 = vmul.f32 1.442695, %v976_v9  ;;  %v1058_v39 = vmul.f32 1.442695, %v980_v55  ;;  %v2981_v47 = vmax.f32 %v800_v50, %v801_v42 }
 0x15d   : > { %3596 = vst [vmem:[#allocation5_spill] sm:$0xff] %v2975_v33  ;;  %v2978_v40 = vpop.f32.mrb[17].mxu1  ;;  %v2210_v56 = vpop.eup %2209  ;;  %v1158_v22 = vadd.f32 %v2208_v46, %v2206_v18  ;;  %v1386_v34 = vmul.f32 %v2208_v46, %v2697_v7  ;;  %v1048_v41 = vmul.f32 1.442695, %v975_v25  ;;  %v977_v49 = vsub.f32 %v2895_v37, %v2971_v28 }
 0x15e   : > { %3597 = vst [vmem:[#allocation6_spill] sm:$0xff] %v2978_v40  ;;  %v2212_v43 = vpop.eup %2211  ;;  %v1384_v48 = vmul.f32 %v2210_v56, %v2704_v10  ;;  %2225 = vpow2.f32 %v1050_v36  ;;  %v2988_v4 = vpop.f32.mrb[18].mxu0  ;;  %v2996_v37 = vmul.f32 1.442695, %v979_v62 }
 0x15f   : > { %v2214_v53 = vpop.eup %2213  ;;  %v1159_v8 = vrot.slane %v1158_v22, 4  ;;  %v1446_v30 = vadd.f32 %v1386_v34, %v1382_v63  ;;  %v1172_v17 = vadd.f32 %v2212_v43, %v2210_v56  ;;  %v1388_v7 = vmul.f32 %v2212_v43, %v2707_v11  ;;  %v2991_v50 = vpop.f32.mrb[18].mxu1 }
 0x160   : > { %3598 = vst [vmem:[#allocation7_spill] sm:$0xff] %v2991_v50  ;;  %v2993_v42 = vpop.f32.mrb[19].mxu0  ;;  %v2216_v10 = vpop.eup %2215  ;;  %v1383_v9 = vmul.f32 %v2214_v53, %v2680_v1  ;;  %2227 = vpow2.f32 %v1058_v39  ;;  %v2998_v55 = vmul.f32 1.442695, %v977_v49 }
 0x161   : > { %3599 = vst [vmem:[#allocation8_spill] sm:$0xff] %v2993_v42  ;;  %v3000_v18 = vpop.f32.mrb[19].mxu1  ;;  %v2218_v25 = vpop.eup %2217  ;;  %v1160_v46 = vadd.f32 %v1159_v8, %v1158_v22  ;;  %v1447_v63 = vrot.slane %v1446_v30, 4  ;;  %v1173_v36 = vrot.slane %v1172_v17, 4  ;;  %v1460_v56 = vadd.f32 %v1388_v7, %v1384_v48 }
 0x162   : > { %3600 = vst [vmem:[#allocation9_spill] sm:$0xff] %v3000_v18  ;;  %v2220_v11 = vpop.eup %2219  ;;  %v1165_v34 = vadd.f32 %v2216_v10, %v2214_v53  ;;  %v1387_v43 = vmul.f32 %v2216_v10, %v2683_v2  ;;  %v1385_v0 = vmul.f32 %v2218_v25, %v2686_v3  ;;  %2229 = vpow2.f32 %v1048_v41  ;;  %v3004_v1 = vpop.f32.mrb[20].mxu0 }
 0x163   : > { %3601 = vst [vmem:[#allocation10_spill] sm:$0xff] %v3004_v1  ;;  %v1161_v62 = vrot.slane %v1160_v46, 2  ;;  %v1448_v39 = vadd.f32 %v1447_v63, %v1446_v30  ;;  %v1174_v49 = vadd.f32 %v1173_v36, %v1172_v17  ;;  %v1461_v6 = vrot.slane %v1460_v56, 4  ;;  %v3006_v40 = vpop.f32.mrb[20].mxu1  ;;  %v3008_v18 = vpop.f32.mrb[21].mxu0 }
 0x164   : > { %3602 = vst [vmem:[#allocation11_spill] sm:$0xff] %v3006_v40  ;;  %3603 = vst [vmem:[#allocation12_spill] sm:$0xff] %v3008_v18  ;;  %v1166_v22 = vrot.slane %v1165_v34, 4  ;;  %v1453_v8 = vadd.f32 %v1387_v43, %v1383_v9  ;;  %v1179_v48 = vadd.f32 %v2220_v11, %v2218_v25  ;;  %v1389_v53 = vmul.f32 %v2220_v11, %v2691_v5  ;;  %v3011_v7 = vpop.f32.mrb[21].mxu1  ;;  %v2222_v2 = vpop.eup %2221 }
 0x165   : > { %3604 = vst [vmem:[#allocation13_spill] sm:$0xff] %v3011_v7  ;;  %v1162_v3 = vadd.f32 %v1161_v62, %v1160_v46  ;;  %v1449_v41 = vrot.slane %v1448_v39, 2  ;;  %v1175_v10 = vrot.slane %v1174_v49, 2  ;;  %v1462_v1 = vadd.f32 %v1461_v6, %v1460_v56  ;;  %v2224_v33 = vpop.eup %2223 }
 0x166   : > { %v1167_v30 = vadd.f32 %v1166_v22, %v1165_v34  ;;  %v1454_v17 = vrot.slane %v1453_v8, 4  ;;  %v1180_v63 = vrot.slane %v1179_v48, 4  ;;  %v1467_v36 = vadd.f32 %v1389_v53, %v1385_v0  ;;  %v3013_v40 = vpop.f32.mrb[22].mxu0 }
 0x167   : > { %3605 = vst [vmem:[#allocation14_spill] sm:$0xff] %v3013_v40  ;;  %v1163_v18 = vrot.slane %v1162_v3, 1  ;;  %v1450_v42 = vadd.f32 %v1449_v41, %v1448_v39  ;;  %v1176_v9 = vadd.f32 %v1175_v10, %v1174_v49  ;;  %v1463_v25 = vrot.slane %v1462_v1, 2  ;;  %v3015_v43 = vpop.f32.mrb[22].mxu1  ;;  %v3017_v5 = vpop.f32.mrb[23].mxu0 }
 0x168   : > { %3606 = vst [vmem:[#allocation15_spill] sm:$0xff] %v3015_v43  ;;  %3607 = vst [vmem:[#allocation16_spill] sm:$0xff] %v3017_v5  ;;  %v2226_v11 = vpop.eup %2225  ;;  %v1168_v46 = vrot.slane %v1167_v30, 2  ;;  %v1455_v62 = vadd.f32 %v1454_v17, %v1453_v8  ;;  %v1181_v7 = vadd.f32 %v1180_v63, %v1179_v48  ;;  %v1468_v6 = vrot.slane %v1467_v36, 4  ;;  %v3019_v56 = vpop.f32.mrb[23].mxu1 }
 0x169   : > { %v1164_v34 = vadd.f32 %v1163_v18, %v1162_v3  ;;  %v1451_v22 = vrot.slane %v1450_v42, 1  ;;  %v1177_v0 = vrot.slane %v1176_v9, 1  ;;  %v1464_v53 = vadd.f32 %v1463_v25, %v1462_v1 }
 0x16a   : > { %v2228_v40 = vpop.eup %2227  ;;  %v1169_v35 = vadd.f32 %v1168_v46, %v1167_v30  ;;  %v1456_v39 = vrot.slane %v1455_v62, 2  ;;  %v1182_v49 = vrot.slane %v1181_v7, 2  ;;  %v1469_v41 = vadd.f32 %v1468_v6, %v1467_v36  ;;  %v3021_v10 = vpop.f32.mrb[24].mxu0 }
 0x16b   : > { %v3023_v43 = vadd.f32 %v1451_v22, %v1450_v42  ;;  %v1178_v5 = vadd.f32 %v1177_v0, %v1176_v9  ;;  %v1465_v50 = vrot.slane %v1464_v53, 1  ;;  %v3609_v8 = vsub.f32 %v2909_v52, %v2971_v28  ;;  %v3028_v17 = vpop.f32.mrb[24].mxu1  ;;  %v3030_v18 = vpop.f32.mrb[25].mxu0 }
 0x16c   : > { %v3032_v1 = vpop.eup %2229  ;;  %v1170_v3 = vrot.slane %v1169_v35, 1  ;;  %v3034_v30 = vadd.f32 %v1456_v39, %v1455_v62  ;;  %v1183_v63 = vadd.f32 %v1182_v49, %v1181_v7  ;;  %v1470_v36 = vrot.slane %v1469_v41, 2  ;;  %v3036_v25 = vpop.f32.mrb[25].mxu1 }
 0x16d   : > { %3608 = vst [vmem:[#allocation17_spill] sm:$0xff] %v3023_v43  ;;  %v1060_v48 = vmul.f32 1.442695, %v3609_v8  ;;  %2231 = vrcp.f32 %v1164_v34  ;;  %v3038_v42 = vadd.f32 %v1465_v50, %v1464_v53  ;;  %v1186_v9 = vadd.f32 %v2224_v33, %v2222_v2 }
 0x16e   : > { %v1390_v52 = vmul.f32 %v2222_v2, %v2722_v19  ;;  %2233 = vrcp.f32 %v1178_v5  ;;  %v1171_v28 = vadd.f32 %v1170_v3, %v1169_v35  ;;  %v1184_v6 = vrot.slane %v1183_v63, 1  ;;  %v3042_v22 = vpop.f32.mrb[26].mxu0 }
 0x16f   : > { %3610 = vst [vmem:[#allocation18_spill] sm:$0xff] %v3038_v42  ;;  %v1187_v0 = vrot.slane %v1186_v9, 4  ;;  %v1394_v62 = vmul.f32 %v2224_v33, %v2725_v20  ;;  %v1200_v7 = vadd.f32 %v2228_v40, %v2226_v11  ;;  %v1392_v39 = vmul.f32 %v2226_v11, %v2728_v21  ;;  %v3046_v49 = vpop.f32.mrb[26].mxu1  ;;  %v3048_v50 = vpop.f32.mrb[27].mxu0 }
 0x170   : > { %2235 = vrcp.f32 %v1171_v28  ;;  %v1185_v34 = vadd.f32 %v1184_v6, %v1183_v63  ;;  %v3050_v19 = vadd.f32 %v1470_v36, %v1469_v41  ;;  %v1396_v35 = vmul.f32 %v2228_v40, %v2733_v23  ;;  %v3053_v2 = vpop.f32.mrb[27].mxu1 }
 0x171   : > { %v1188_v5 = vadd.f32 %v1187_v0, %v1186_v9  ;;  %v1474_v53 = vadd.f32 %v1394_v62, %v1390_v52  ;;  %v1201_v8 = vrot.slane %v1200_v7, 4  ;;  %2237 = vpow2.f32 %v2996_v37 }
 0x172   : > { %3611 = vst [vmem:[#allocation19_spill] sm:$0xff] %v3050_v19  ;;  %2239 = vrcp.f32 %v1185_v34  ;;  %v1488_v20 = vadd.f32 %v1396_v35, %v1392_v39  ;;  %v3058_v21 = vmul.f32 %v3032_v1, %v2710_v12  ;;  %v803_v33 = vrot.slane %v2981_v47, 1  ;;  %v3061_v11 = vpop.f32.mrb[28].mxu0  ;;  %v2413_v19 = vld [vmem:[%s2677_s7 + $0xd8] sm:$0xff] }
 0x173   : > { %v1189_v41 = vrot.slane %v1188_v5, 2  ;;  %v1475_v3 = vrot.slane %v1474_v53, 4  ;;  %v1202_v23 = vadd.f32 %v1201_v8, %v1200_v7  ;;  %2241 = vpow2.f32 %v2998_v55  ;;  %v3064_v40 = vpop.f32.mrb[28].mxu1  ;;  %v3066_v63 = vpop.f32.mrb[29].mxu0 }
 0x174   : > { %v1489_v37 = vrot.slane %v1488_v20, 4  ;;  %2243 = vpow2.f32 %v1060_v48  ;;  %v804_v36 = vmax.f32 %v2981_v47, %v803_v33  ;;  %v815_v12 = vrot.slane %v2961_v57, 2  ;;  %v3070_v9 = vpop.f32.mrb[29].mxu1 }
 0x175   : > { %v1190_v52 = vadd.f32 %v1189_v41, %v1188_v5  ;;  %v1476_v28 = vadd.f32 %v1475_v3, %v1474_v53  ;;  %v1203_v6 = vrot.slane %v1202_v23, 2  ;;  %v806_v0 = vrot.slane %v2965_v58, 4 }
 0x176   : > { %v1490_v62 = vadd.f32 %v1489_v37, %v1488_v20  ;;  %v982_v55 = vsub.f32 %v2913_v61, %v804_v36  ;;  %v986_v7 = vsub.f32 %v2927_v45, %v804_v36  ;;  %v816_v39 = vmax.f32 %v2961_v57, %v815_v12  ;;  %v3076_v34 = vpop.f32.mrb[30].mxu0 }
 0x177   : > { %v3078_v48 = vpop.eup %2231  ;;  %v1191_v47 = vrot.slane %v1190_v52, 1  ;;  %v1477_v35 = vrot.slane %v1476_v28, 2  ;;  %v1204_v8 = vadd.f32 %v1203_v6, %v1202_v23  ;;  %v807_v5 = vmax.f32 %v2965_v58, %v806_v0  ;;  %v3081_v53 = vpop.f32.mrb[30].mxu1 }
 0x178   : > { %3612 = vst [vmem:[#allocation20_spill] sm:$0xff] %v3078_v48  ;;  %v3083_v33 = vpop.f32.mrb[31].mxu0  ;;  %v3085_v20 = vpop.eup %2233  ;;  %v1491_v61 = vrot.slane %v1490_v62, 2  ;;  %v1062_v41 = vmul.f32 1.442695, %v982_v55  ;;  %v817_v3 = vrot.slane %v816_v39, 1  ;;  %v819_v58 = vmax.f32 %v2919_v32, %v2935_v60 }
 0x179   : > { %3613 = vst [vmem:[#allocation21_spill] sm:$0xff] %v3085_v20  ;;  %v1070_v45 = vmul.f32 1.442695, %v986_v7  ;;  %v1192_v57 = vadd.f32 %v1191_v47, %v1190_v52  ;;  %v1478_v37 = vadd.f32 %v1477_v35, %v1476_v28  ;;  %v1205_v36 = vrot.slane %v1204_v8, 1 }
 0x17a   : > { %v808_v12 = vrot.slane %v807_v5, 2  ;;  %v3087_v46 = vpop.eup %2235  ;;  %v1492_v42 = vadd.f32 %v1491_v61, %v1490_v62  ;;  %2245 = vpow2.f32 %v1062_v41  ;;  %v818_v23 = vmax.f32 %v816_v39, %v817_v3  ;;  %v3096_v39 = vpop.f32.mrb[31].mxu1 }
 0x17b   : > { %v2238_v6 = vpop.eup %2237  ;;  %v1479_v20 = vrot.slane %v1478_v37, 1  ;;  %2247 = vrcp.f32 %v1192_v57  ;;  %v1206_v55 = vadd.f32 %v1205_v36, %v1204_v8  ;;  %v2397_v36 = vld [vmem:[%s2677_s7 + $0x58] sm:$0xff] }
 0x17c   : > { %v3092_v7 = vpop.eup %2239  ;;  %v1193_v52 = vadd.f32 %v2238_v6, %v3032_v1  ;;  %v1395_v28 = vmul.f32 %v2238_v6, %v2715_v14  ;;  %2249 = vpow2.f32 %v1070_v45  ;;  %v809_v62 = vmax.f32 %v807_v5, %v808_v12  ;;  %v2398_v45 = vld [vmem:[%s2677_s7 + $0x78] sm:$0xff] }
 0x17d   : > { %3614 = vst [vmem:[#allocation22_spill] sm:$0xff] %v3092_v7  ;;  %v2242_v47 = vpop.eup %2241  ;;  %v3098_v35 = vadd.f32 %v1479_v20, %v1478_v37  ;;  %v1493_v61 = vrot.slane %v1492_v42, 1  ;;  %v984_v41 = vsub.f32 %v2915_v24, %v818_v23  ;;  %v988_v8 = vsub.f32 %v2931_v51, %v818_v23 }
 0x17e   : > { %v2244_v3 = vpop.eup %2243  ;;  %2251 = vrcp.f32 %v1206_v55  ;;  %v1194_v57 = vrot.slane %v1193_v52, 4  ;;  %v1481_v1 = vadd.f32 %v1395_v28, %v3058_v21  ;;  %v1393_v14 = vmul.f32 %v2397_v36, %v2242_v47 }
 0x17f   : > { %3615 = vst [vmem:[#allocation23_spill] sm:$0xff] %v3098_v35  ;;  %v1207_v6 = vadd.f32 %v2244_v3, %v2242_v47  ;;  %v1397_v5 = vmul.f32 %v2398_v45, %v2244_v3  ;;  %v1066_v12 = vmul.f32 1.442695, %v984_v41  ;;  %v1074_v0 = vmul.f32 1.442695, %v988_v8 }
 0x180   : > { %v1195_v48 = vadd.f32 %v1194_v57, %v1193_v52  ;;  %v1482_v20 = vrot.slane %v1481_v1, 4  ;;  %v810_v37 = vrot.slane %v809_v62, 1  ;;  %v820_v35 = vrot.slane %v819_v58, 4 }
 0x181   : > { %v1208_v43 = vrot.slane %v1207_v6, 4  ;;  %v1495_v24 = vadd.f32 %v1397_v5, %v1393_v14  ;;  %2253 = vpow2.f32 %v1066_v12  ;;  %v826_v51 = vmax.f32 %v2937_v13, %v2951_v44 }
 0x182   : > { %v1196_v23 = vrot.slane %v1195_v48, 2  ;;  %v1483_v21 = vadd.f32 %v1482_v20, %v1481_v1  ;;  %2255 = vpow2.f32 %v1074_v0  ;;  %v811_v55 = vmax.f32 %v809_v62, %v810_v37  ;;  %v2399_v1 = vld [vmem:[%s2677_s7 + $0x80] sm:$0xff] }
 0x183   : > { %v3107_v28 = vadd.f32 %v1493_v61, %v1492_v42  ;;  %v1209_v47 = vadd.f32 %v1208_v43, %v1207_v6  ;;  %v1496_v41 = vrot.slane %v1495_v24, 4  ;;  %v821_v8 = vmax.f32 %v819_v58, %v820_v35 }
 0x184   : > { %v2246_v52 = vpop.eup %2245  ;;  %v1197_v3 = vadd.f32 %v1196_v23, %v1195_v48  ;;  %v1484_v57 = vrot.slane %v1483_v21, 2  ;;  %v983_v36 = vsub.f32 %v2917_v26, %v811_v55  ;;  %v987_v14 = vsub.f32 %v2933_v15, %v811_v55  ;;  %v2400_v26 = vld [vmem:[%s2677_s7 + $0xa0] sm:$0xff] }
 0x185   : > { %3616 = vst [vmem:[#allocation24_spill] sm:$0xff] %v3107_v28  ;;  %v3111_v45 = vpop.eup %2247  ;;  %v1210_v5 = vrot.slane %v1209_v47, 2  ;;  %v1497_v12 = vadd.f32 %v1496_v41, %v1495_v24  ;;  %v1398_v0 = vmul.f32 %v2399_v1, %v2246_v52  ;;  %v822_v62 = vrot.slane %v821_v8, 2 }
 0x186   : > { %3617 = vst [vmem:[#allocation25_spill] sm:$0xff] %v3111_v45  ;;  %v2250_v42 = vpop.eup %2249  ;;  %v1198_v61 = vrot.slane %v1197_v3, 1  ;;  %v3114_v43 = vadd.f32 %v1484_v57, %v1483_v21  ;;  %v1064_v58 = vmul.f32 1.442695, %v983_v36  ;;  %v827_v35 = vrot.slane %v826_v51, 4 }
 0x187   : > { %v1211_v48 = vadd.f32 %v1210_v5, %v1209_v47  ;;  %v1498_v6 = vrot.slane %v1497_v12, 2  ;;  %v1214_v20 = vadd.f32 %v2250_v42, %v2246_v52  ;;  %v1402_v37 = vmul.f32 %v2400_v26, %v2250_v42 }
 0x188   : > { %v3117_v23 = vpop.eup %2251  ;;  %v1199_v15 = vadd.f32 %v1198_v61, %v1197_v3  ;;  %2257 = vpow2.f32 %v1064_v58  ;;  %v1072_v55 = vmul.f32 1.442695, %v987_v14  ;;  %v823_v24 = vmax.f32 %v821_v8, %v822_v62  ;;  %v2401_v8 = vld [vmem:[%s2677_s7 + $0x90] sm:$0xff] }
 0x189   : > { %3618 = vst [vmem:[#allocation26_spill] sm:$0xff] %v3117_v23  ;;  %v1212_v41 = vrot.slane %v1211_v48, 1  ;;  %v3119_v1 = vadd.f32 %v1498_v6, %v1497_v12  ;;  %v1215_v28 = vrot.slane %v1214_v20, 4  ;;  %v1502_v21 = vadd.f32 %v1402_v37, %v1398_v0 }
 0x18a   : > { %v824_v36 = vrot.slane %v823_v24, 1  ;;  %v828_v47 = vmax.f32 %v826_v51, %v827_v35  ;;  %v840_v52 = vmax.f32 %v2943_v16, %v2953_v29  ;;  %2259 = vrcp.f32 %v1199_v15  ;;  %v2402_v35 = vld [vmem:[%s2677_s7 + $0xb0] sm:$0xff] }
 0x18b   : > { %3619 = vst [vmem:[#allocation27_spill] sm:$0xff] %v3119_v1  ;;  %v2254_v5 = vpop.eup %2253  ;;  %v1213_v3 = vadd.f32 %v1212_v41, %v1211_v48  ;;  %v1216_v42 = vadd.f32 %v1215_v28, %v1214_v20  ;;  %v1503_v14 = vrot.slane %v1502_v21, 4  ;;  %2261 = vpow2.f32 %v1072_v55 }
 0x18c   : > { %v2256_v61 = vpop.eup %2255  ;;  %v1400_v62 = vmul.f32 %v2401_v8, %v2254_v5  ;;  %v825_v12 = vmax.f32 %v823_v24, %v824_v36  ;;  %v829_v58 = vrot.slane %v828_v47, 2  ;;  %v841_v23 = vrot.slane %v840_v52, 4 }
 0x18d   : > { %v1217_v6 = vrot.slane %v1216_v42, 2  ;;  %v1504_v26 = vadd.f32 %v1503_v14, %v1502_v21  ;;  %v1228_v51 = vadd.f32 %v2256_v61, %v2254_v5  ;;  %v1404_v37 = vmul.f32 %v2402_v35, %v2256_v61 }
 0x18e   : > { %v985_v57 = vsub.f32 %v2919_v32, %v825_v12  ;;  %v989_v15 = vsub.f32 %v2935_v60, %v825_v12  ;;  %v830_v48 = vmax.f32 %v828_v47, %v829_v58  ;;  %v842_v5 = vmax.f32 %v840_v52, %v841_v23 }
 0x18f   : > { %v1218_v28 = vadd.f32 %v1217_v6, %v1216_v42  ;;  %v1505_v20 = vrot.slane %v1504_v26, 2  ;;  %v1229_v41 = vrot.slane %v1228_v51, 4  ;;  %v1516_v8 = vadd.f32 %v1404_v37, %v1400_v62  ;;  %v2403_v6 = vld [vmem:[%s2677_s7 + $0x88] sm:$0xff] }
 0x190   : > { %v1068_v55 = vmul.f32 1.442695, %v985_v57  ;;  %v1076_v24 = vmul.f32 1.442695, %v989_v15  ;;  %v831_v36 = vrot.slane %v830_v48, 1  ;;  %v833_v60 = vmax.f32 %v2945_v27, %v2955_v31 }
 0x191   : > { %v1219_v45 = vrot.slane %v1218_v28, 1  ;;  %v3129_v0 = vadd.f32 %v1505_v20, %v1504_v26  ;;  %v1230_v21 = vadd.f32 %v1229_v41, %v1228_v51  ;;  %v1517_v61 = vrot.slane %v1516_v8, 4  ;;  %v2404_v41 = vld [vmem:[%s2677_s7 + $0xa8] sm:$0xff] }
 0x192   : > { %v2258_v14 = vpop.eup %2257  ;;  %2263 = vpow2.f32 %v1068_v55  ;;  %v832_v32 = vmax.f32 %v830_v48, %v831_v36  ;;  %v843_v51 = vrot.slane %v842_v5, 2  ;;  %v834_v35 = vrot.slane %v833_v60, 4 }
 0x193   : > { %3620 = vst [vmem:[#allocation28_spill] sm:$0xff] %v3129_v0  ;;  %2265 = vrcp.f32 %v1213_v3  ;;  %v1220_v47 = vadd.f32 %v1219_v45, %v1218_v28  ;;  %v1231_v57 = vrot.slane %v1230_v21, 2  ;;  %v1518_v62 = vadd.f32 %v1517_v61, %v1516_v8 }
 0x194   : > { %2267 = vpow2.f32 %v1076_v24  ;;  %v990_v12 = vsub.f32 %v2937_v13, %v832_v32  ;;  %v994_v23 = vsub.f32 %v2951_v44, %v832_v32  ;;  %v3136_v52 = vpop.eup %2259  ;;  %v1399_v26 = vmul.f32 %v2403_v6, %v2258_v14 }
 0x195   : > { %v1232_v58 = vadd.f32 %v1231_v57, %v1230_v21  ;;  %v2262_v37 = vpop.eup %2261  ;;  %v1519_v3 = vrot.slane %v1518_v62, 2  ;;  %v847_v48 = vmax.f32 %v2947_v38, %v2957_v54  ;;  %v844_v8 = vmax.f32 %v842_v5, %v843_v51 }
 0x196   : > { %v1078_v45 = vmul.f32 1.442695, %v990_v12  ;;  %v1086_v15 = vmul.f32 1.442695, %v994_v23  ;;  %v1221_v20 = vadd.f32 %v2262_v37, %v2258_v14  ;;  %v1403_v13 = vmul.f32 %v2404_v41, %v2262_v37 }
 0x197   : > { %v1233_v28 = vrot.slane %v1232_v58, 1  ;;  %v3142_v44 = vadd.f32 %v1519_v3, %v1518_v62  ;;  %v835_v55 = vmax.f32 %v833_v60, %v834_v35  ;;  %v848_v24 = vrot.slane %v847_v48, 4  ;;  %v3623_v35 = vld [vmem:[#allocation4_spill] sm:$0xff] }
 0x198   : > { %2269 = vpow2.f32 %v1078_v45  ;;  %v1222_v21 = vrot.slane %v1221_v20, 4  ;;  %v1509_v61 = vadd.f32 %v1403_v13, %v1399_v26  ;;  %v845_v32 = vrot.slane %v844_v8, 1  ;;  %v3622_v26 = vld [vmem:[#allocation7_spill] sm:$0xff] }
 0x199   : > { %3621 = vst [vmem:[#allocation29_spill] sm:$0xff] %v3142_v44  ;;  %v1234_v36 = vadd.f32 %v1233_v28, %v1232_v58  ;;  %2271 = vpow2.f32 %v1086_v15  ;;  %v836_v57 = vrot.slane %v835_v55, 2  ;;  %v849_v12 = vmax.f32 %v847_v48, %v848_v24  ;;  %v2405_v15 = vld [vmem:[%s2677_s7 + $0x98] sm:$0xff] }
 0x19a   : > { %2273 = vrcp.f32 %v1220_v47  ;;  %v1223_v14 = vadd.f32 %v1222_v21, %v1221_v20  ;;  %v1510_v6 = vrot.slane %v1509_v61, 4  ;;  %v3147_v5 = vmax.f32 %v2967_v59, %v2988_v4  ;;  %v2406_v21 = vld [vmem:[%s2677_s7 + $0xb8] sm:$0xff] }
 0x19b   : > { %v846_v60 = vmax.f32 %v844_v8, %v845_v32  ;;  %v837_v51 = vmax.f32 %v835_v55, %v836_v57  ;;  %v850_v58 = vrot.slane %v849_v12, 2  ;;  %v3151_v47 = vmax.f32 %v3623_v35, %v3622_v26 }
 0x19c   : > { %v2264_v62 = vpop.eup %2263  ;;  %2275 = vrcp.f32 %v1234_v36  ;;  %v1224_v3 = vrot.slane %v1223_v14, 2  ;;  %v1511_v45 = vadd.f32 %v1510_v6, %v1509_v61  ;;  %v855_v57 = vrot.slane %v3147_v5, 4 }
 0x19d   : > { %v3153_v37 = vpop.eup %2265  ;;  %v1401_v48 = vmul.f32 %v2405_v15, %v2264_v62  ;;  %v992_v20 = vsub.f32 %v2943_v16, %v846_v60  ;;  %v996_v41 = vsub.f32 %v2953_v29, %v846_v60  ;;  %v838_v13 = vrot.slane %v837_v51, 1 }
 0x19e   : > { %3624 = vst [vmem:[#allocation7_spill] sm:$0xff] %v3153_v37  ;;  %v2268_v28 = vpop.eup %2267  ;;  %v851_v8 = vmax.f32 %v849_v12, %v850_v58  ;;  %v1225_v55 = vadd.f32 %v1224_v3, %v1223_v14  ;;  %v1512_v15 = vrot.slane %v1511_v45, 2 }
 0x19f   : > { %v1235_v24 = vadd.f32 %v2268_v28, %v2264_v62  ;;  %v1405_v32 = vmul.f32 %v2406_v21, %v2268_v28  ;;  %v1082_v23 = vmul.f32 1.442695, %v992_v20  ;;  %v1090_v42 = vmul.f32 1.442695, %v996_v41  ;;  %v2407_v28 = vld [vmem:[%s2677_s7 + $0xc0] sm:$0xff] }
 0x1a0   : > { %v839_v36 = vmax.f32 %v837_v51, %v838_v13  ;;  %v852_v61 = vrot.slane %v851_v8, 1  ;;  %v1226_v6 = vrot.slane %v1225_v55, 1  ;;  %v2408_v13 = vld [vmem:[%s2677_s7 + $0xe0] sm:$0xff] }
 0x1a1   : > { %v1236_v44 = vrot.slane %v1235_v24, 4  ;;  %v1523_v16 = vadd.f32 %v1405_v32, %v1401_v48  ;;  %2277 = vpow2.f32 %v1082_v23 }
 0x1a2   : > { %v2270_v0 = vpop.eup %2269  ;;  %v991_v29 = vsub.f32 %v2945_v27, %v839_v36  ;;  %v995_v12 = vsub.f32 %v2955_v31, %v839_v36  ;;  %v853_v14 = vmax.f32 %v851_v8, %v852_v61  ;;  %v1227_v60 = vadd.f32 %v1226_v6, %v1225_v55 }
 0x1a3   : > { %v2272_v62 = vpop.eup %2271  ;;  %v1237_v58 = vadd.f32 %v1236_v44, %v1235_v24  ;;  %v1524_v3 = vrot.slane %v1523_v16, 4  ;;  %v1406_v20 = vmul.f32 %v2407_v28, %v2270_v0  ;;  %2279 = vpow2.f32 %v1090_v42 }
 0x1a4   : > { %v3163_v51 = vpop.eup %2273  ;;  %v1242_v41 = vadd.f32 %v2272_v62, %v2270_v0  ;;  %v1410_v21 = vmul.f32 %v2408_v13, %v2272_v62  ;;  %v1080_v48 = vmul.f32 1.442695, %v991_v29  ;;  %2281 = vrcp.f32 %v1227_v60 }
 0x1a5   : > { %3625 = vst [vmem:[#allocation4_spill] sm:$0xff] %v3163_v51  ;;  %v1238_v23 = vrot.slane %v1237_v58, 2  ;;  %v1525_v32 = vadd.f32 %v1524_v3, %v1523_v16  ;;  %v1088_v27 = vmul.f32 1.442695, %v995_v12  ;;  %v993_v8 = vsub.f32 %v2947_v38, %v853_v14 }
 0x1a6   : > { %v1243_v37 = vrot.slane %v1242_v41, 4  ;;  %v1530_v31 = vadd.f32 %v1410_v21, %v1406_v20  ;;  %2283 = vpow2.f32 %v1080_v48  ;;  %v3167_v44 = vpop.eup %2275  ;;  %v3169_v55 = vadd.f32 %v1512_v15, %v1511_v45  ;;  %v3629_v20 = vld [vmem:[#allocation9_spill] sm:$0xff]  ;;  %v2409_v48 = vld [vmem:[%s2677_s7 + $0xd0] sm:$0xff] }
 0x1a7   : > { %3626 = vst [vmem:[#allocation30_spill] sm:$0xff] %v3167_v44  ;;  %v1239_v24 = vadd.f32 %v1238_v23, %v1237_v58  ;;  %2285 = vpow2.f32 %v1088_v27  ;;  %v997_v0 = vsub.f32 %v2957_v54, %v853_v14  ;;  %v1084_v61 = vmul.f32 1.442695, %v993_v8  ;;  %v3627_v54 = vld [vmem:[#allocation8_spill] sm:$0xff] }
 0x1a8   : > { %v1244_v36 = vadd.f32 %v1243_v37, %v1242_v41  ;;  %v1531_v42 = vrot.slane %v1530_v31, 4  ;;  %v856_v6 = vmax.f32 %v3147_v5, %v855_v57  ;;  %v1526_v29 = vrot.slane %v1525_v32, 2  ;;  %v3628_v37 = vld [vmem:[#allocation5_spill] sm:$0xff]  ;;  %v3630_v41 = vld [vmem:[#allocation6_spill] sm:$0xff] }
 0x1a9   : > { %v1240_v16 = vrot.slane %v1239_v24, 1  ;;  %v1092_v12 = vmul.f32 1.442695, %v997_v0  ;;  %v869_v62 = vrot.slane %v3151_v47, 4  ;;  %2287 = vpow2.f32 %v1084_v61 }
 0x1aa   : > { %v1245_v38 = vrot.slane %v1244_v36, 2  ;;  %v1532_v60 = vadd.f32 %v1531_v42, %v1530_v31  ;;  %v857_v45 = vrot.slane %v856_v6, 2  ;;  %v861_v14 = vmax.f32 %v3628_v37, %v3627_v54 }
 0x1ab   : > { %v1241_v15 = vadd.f32 %v1240_v16, %v1239_v24  ;;  %2289 = vpow2.f32 %v1092_v12  ;;  %v870_v58 = vmax.f32 %v3151_v47, %v869_v62  ;;  %v2278_v3 = vpop.eup %2277  ;;  %v875_v13 = vmax.f32 %v3630_v41, %v3629_v20 }
 0x1ac   : > { %v1246_v28 = vadd.f32 %v1245_v38, %v1244_v36  ;;  %v1533_v5 = vrot.slane %v1532_v60, 2  ;;  %v858_v57 = vmax.f32 %v856_v6, %v857_v45  ;;  %v3179_v21 = vadd.f32 %v1526_v29, %v1525_v32  ;;  %v2410_v6 = vld [vmem:[%s2677_s7 + $0xf0] sm:$0xff] }
 0x1ad   : > { %v1408_v23 = vmul.f32 %v2409_v48, %v2278_v3  ;;  %v871_v27 = vrot.slane %v870_v58, 2  ;;  %v862_v31 = vrot.slane %v861_v14, 4  ;;  %v2280_v8 = vpop.eup %2279  ;;  %2291 = vrcp.f32 %v1241_v15  ;;  %v3634_v45 = vld [vmem:[#allocation14_spill] sm:$0xff] }
 0x1ae   : > { %3631 = vst [vmem:[#allocation8_spill] sm:$0xff] %v3179_v21  ;;  %v1247_v47 = vrot.slane %v1246_v28, 1  ;;  %v859_v24 = vrot.slane %v858_v57, 1  ;;  %v876_v0 = vrot.slane %v875_v13, 4  ;;  %v3182_v42 = vpop.eup %2281  ;;  %v3184_v36 = vadd.f32 %v1533_v5, %v1532_v60  ;;  %v3635_v48 = vld [vmem:[#allocation10_spill] sm:$0xff]  ;;  %v2411_v21 = vld [vmem:[%s2677_s7 + $0xc8] sm:$0xff] }
 0x1af   : > { %3632 = vst [vmem:[#allocation5_spill] sm:$0xff] %v3182_v42  ;;  %v1256_v61 = vadd.f32 %v2280_v8, %v2278_v3  ;;  %v1412_v16 = vmul.f32 %v2410_v6, %v2280_v8  ;;  %v872_v32 = vmax.f32 %v870_v58, %v871_v27  ;;  %v863_v38 = vmax.f32 %v861_v14, %v862_v31  ;;  %v2412_v3 = vld [vmem:[%s2677_s7 + $0xe8] sm:$0xff] }
 0x1b0   : > { %3633 = vst [vmem:[#allocation9_spill] sm:$0xff] %v3184_v36  ;;  %v2284_v29 = vpop.eup %2283  ;;  %v1248_v12 = vadd.f32 %v1247_v47, %v1246_v28  ;;  %v860_v62 = vmax.f32 %v858_v57, %v859_v24  ;;  %v3189_v15 = vmax.f32 %v3635_v48, %v3634_v45  ;;  %v877_v27 = vmax.f32 %v875_v13, %v876_v0 }
 0x1b1   : > { %v2286_v44 = vpop.eup %2285  ;;  %v1257_v51 = vrot.slane %v1256_v61, 4  ;;  %v1544_v7 = vadd.f32 %v1412_v16, %v1408_v23  ;;  %v1407_v1 = vmul.f32 %v2411_v21, %v2284_v29  ;;  %v873_v60 = vrot.slane %v872_v32, 1 }
 0x1b2   : > { %v1249_v5 = vadd.f32 %v2286_v44, %v2284_v29  ;;  %v1411_v36 = vmul.f32 %v2412_v3, %v2286_v44  ;;  %v998_v58 = vsub.f32 %v2967_v59, %v860_v62  ;;  %v1002_v14 = vsub.f32 %v2988_v4, %v860_v62 }
 0x1b3   : > { %v1258_v28 = vadd.f32 %v1257_v51, %v1256_v61  ;;  %v1545_v57 = vrot.slane %v1544_v7, 4  ;;  %v874_v31 = vmax.f32 %v872_v32, %v873_v60  ;;  %v2288_v8 = vpop.eup %2287  ;;  %v864_v6 = vrot.slane %v863_v38, 2  ;;  %v2414_v51 = vld [vmem:[%s2677_s7 + $0xf8] sm:$0xff] }
 0x1b4   : > { %v1250_v47 = vrot.slane %v1249_v5, 4  ;;  %v1537_v24 = vadd.f32 %v1411_v36, %v1407_v1  ;;  %v1094_v23 = vmul.f32 1.442695, %v998_v58  ;;  %v1409_v42 = vmul.f32 %v2413_v19, %v2288_v8 }
 0x1b5   : > { %v2290_v21 = vpop.eup %2289  ;;  %v1259_v16 = vrot.slane %v1258_v28, 2  ;;  %v1546_v29 = vadd.f32 %v1545_v57, %v1544_v7  ;;  %v1102_v44 = vmul.f32 1.442695, %v1002_v14  ;;  %v1000_v32 = vsub.f32 %v3623_v35, %v874_v31 }
 0x1b6   : > { %v1251_v3 = vadd.f32 %v1250_v47, %v1249_v5  ;;  %v1538_v59 = vrot.slane %v1537_v24, 4  ;;  %v1263_v13 = vadd.f32 %v2290_v21, %v2288_v8  ;;  %v1413_v0 = vmul.f32 %v2414_v51, %v2290_v21 }
 0x1b7   : > { %v1260_v61 = vadd.f32 %v1259_v16, %v1258_v28  ;;  %v1547_v4 = vrot.slane %v1546_v29, 2  ;;  %2293 = vpow2.f32 %v1094_v23  ;;  %v3198_v62 = vpop.eup %2291  ;;  %v1004_v19 = vsub.f32 %v3622_v26, %v874_v31  ;;  %v3637_v26 = vld [vmem:[#allocation11_spill] sm:$0xff] }
 0x1b8   : > { %2295 = vrcp.f32 %v1248_v12  ;;  %v1252_v1 = vrot.slane %v1251_v3, 2  ;;  %v1264_v36 = vrot.slane %v1263_v13, 4  ;;  %v1551_v60 = vadd.f32 %v1413_v0, %v1409_v42 }
 0x1b9   : > { %v1261_v7 = vrot.slane %v1260_v61, 1  ;;  %v3200_v58 = vadd.f32 %v1538_v59, %v1537_v24  ;;  %2297 = vpow2.f32 %v1102_v44  ;;  %v3203_v5 = vadd.f32 %v1547_v4, %v1546_v29  ;;  %v3636_v59 = vld [vmem:[#allocation15_spill] sm:$0xff] }
 0x1ba   : > { %v1253_v57 = vadd.f32 %v1252_v1, %v1251_v3  ;;  %v1265_v28 = vadd.f32 %v1264_v36, %v1263_v13  ;;  %v1552_v14 = vrot.slane %v1551_v60, 4  ;;  %v1098_v47 = vmul.f32 1.442695, %v1000_v32  ;;  %v3638_v32 = vld [vmem:[#allocation16_spill] sm:$0xff] }
 0x1bb   : > { %v1262_v8 = vadd.f32 %v1261_v7, %v1260_v61  ;;  %v1106_v35 = vmul.f32 1.442695, %v1004_v19  ;;  %v865_v23 = vmax.f32 %v863_v38, %v864_v6  ;;  %v878_v42 = vrot.slane %v877_v27, 2  ;;  %v3639_v1 = vld [vmem:[#allocation12_spill] sm:$0xff] }
 0x1bc   : > { %v1254_v21 = vrot.slane %v1253_v57, 1  ;;  %v1266_v12 = vrot.slane %v1265_v28, 2  ;;  %v3205_v16 = vadd.f32 %v1552_v14, %v1551_v60  ;;  %v883_v44 = vrot.slane %v3189_v15, 4 }
 0x1bd   : > { %2299 = vrcp.f32 %v1262_v8  ;;  %v866_v24 = vrot.slane %v865_v23, 1  ;;  %v896_v31 = vmax.f32 %v3637_v26, %v3636_v59  ;;  %v879_v6 = vmax.f32 %v877_v27, %v878_v42  ;;  %v2415_v27 = vld [vmem:[%s2677_s7 + $0x100] sm:$0xff] }
 0x1be   : > { %v1255_v29 = vadd.f32 %v1254_v21, %v1253_v57  ;;  %v1267_v13 = vadd.f32 %v1266_v12, %v1265_v28  ;;  %2301 = vpow2.f32 %v1098_v47  ;;  %v884_v51 = vmax.f32 %v3189_v15, %v883_v44 }
 0x1bf   : > { %2303 = vpow2.f32 %v1106_v35  ;;  %v867_v38 = vmax.f32 %v865_v23, %v866_v24  ;;  %v897_v4 = vrot.slane %v896_v31, 4  ;;  %v889_v36 = vmax.f32 %v3639_v1, %v3638_v32 }
 0x1c0   : > { %v1268_v0 = vrot.slane %v1267_v13, 1  ;;  %v880_v57 = vrot.slane %v879_v6, 1  ;;  %v885_v28 = vrot.slane %v884_v51, 2  ;;  %2305 = vrcp.f32 %v1255_v29 }
 0x1c1   : > { %v2294_v60 = vpop.eup %2293  ;;  %v999_v7 = vsub.f32 %v3628_v37, %v867_v38  ;;  %v1003_v19 = vsub.f32 %v3627_v54, %v867_v38  ;;  %v898_v8 = vmax.f32 %v896_v31, %v897_v4  ;;  %v890_v47 = vrot.slane %v889_v36, 4  ;;  %v2416_v37 = vld [vmem:[%s2677_s7 + $0x120] sm:$0xff] }
 0x1c2   : > { %v3217_v14 = vpop.eup %2295  ;;  %v1414_v15 = vmul.f32 %v2415_v27, %v2294_v60  ;;  %v881_v12 = vmax.f32 %v879_v6, %v880_v57  ;;  %v886_v42 = vmax.f32 %v884_v51, %v885_v28  ;;  %v1269_v24 = vadd.f32 %v1268_v0, %v1267_v13 }
 0x1c3   : > { %v2298_v35 = vpop.eup %2297  ;;  %v1096_v23 = vmul.f32 1.442695, %v999_v7  ;;  %v1104_v21 = vmul.f32 1.442695, %v1003_v19  ;;  %v899_v54 = vrot.slane %v898_v8, 2  ;;  %v891_v0 = vmax.f32 %v889_v36, %v890_v47 }
 0x1c4   : > { %v1270_v44 = vadd.f32 %v2298_v35, %v2294_v60  ;;  %v1418_v61 = vmul.f32 %v2416_v37, %v2298_v35  ;;  %v1001_v38 = vsub.f32 %v3630_v41, %v881_v12  ;;  %v1005_v3 = vsub.f32 %v3629_v20, %v881_v12  ;;  %v3641_v41 = vld [vmem:[#allocation13_spill] sm:$0xff] }
 0x1c5   : > { %2307 = vpow2.f32 %v1096_v23  ;;  %v887_v29 = vrot.slane %v886_v42, 1  ;;  %v900_v4 = vmax.f32 %v898_v8, %v899_v54  ;;  %v903_v20 = vmax.f32 %v3641_v41, %v3019_v56  ;;  %v2417_v23 = vld [vmem:[%s2677_s7 + $0x110] sm:$0xff] }
 0x1c6   : > { %v1271_v27 = vrot.slane %v1270_v44, 4  ;;  %v1558_v31 = vadd.f32 %v1418_v61, %v1414_v15  ;;  %2309 = vpow2.f32 %v1104_v21  ;;  %v1100_v6 = vmul.f32 1.442695, %v1001_v38  ;;  %v2418_v21 = vld [vmem:[%s2677_s7 + $0x130] sm:$0xff] }
 0x1c7   : > { %v3223_v7 = vpop.eup %2299  ;;  %v1108_v51 = vmul.f32 1.442695, %v1005_v3  ;;  %v888_v13 = vmax.f32 %v886_v42, %v887_v29  ;;  %v901_v28 = vrot.slane %v900_v4, 1 }
 0x1c8   : > { %3640 = vst [vmem:[#allocation6_spill] sm:$0xff] %v3223_v7  ;;  %v2302_v60 = vpop.eup %2301  ;;  %v1272_v19 = vadd.f32 %v1271_v27, %v1270_v44  ;;  %v1559_v57 = vrot.slane %v1558_v31, 4  ;;  %2311 = vpow2.f32 %v1100_v6 }
 0x1c9   : > { %v2304_v35 = vpop.eup %2303  ;;  %v1416_v12 = vmul.f32 %v2417_v23, %v2302_v60  ;;  %v1006_v61 = vsub.f32 %v3635_v48, %v888_v13  ;;  %v1010_v15 = vsub.f32 %v3634_v45, %v888_v13  ;;  %2313 = vrcp.f32 %v1269_v24 }
 0x1ca   : > { %v1273_v3 = vrot.slane %v1272_v19, 2  ;;  %v1284_v8 = vadd.f32 %v2304_v35, %v2302_v60  ;;  %v1420_v36 = vmul.f32 %v2418_v21, %v2304_v35  ;;  %2315 = vpow2.f32 %v1108_v51  ;;  %v3231_v37 = vpop.eup %2305 }
 0x1cb   : > { %v1110_v47 = vmul.f32 1.442695, %v1006_v61  ;;  %v1118_v42 = vmul.f32 1.442695, %v1010_v15  ;;  %v902_v44 = vmax.f32 %v900_v4, %v901_v28  ;;  %v3233_v38 = vadd.f32 %v1559_v57, %v1558_v31 }
 0x1cc   : > { %v1274_v54 = vadd.f32 %v1273_v3, %v1272_v19  ;;  %v1285_v29 = vrot.slane %v1284_v8, 4  ;;  %v1572_v27 = vadd.f32 %v1420_v36, %v1416_v12  ;;  %v892_v24 = vrot.slane %v891_v0, 2 }
 0x1cd   : > { %2317 = vpow2.f32 %v1110_v47  ;;  %v1008_v48 = vsub.f32 %v3637_v26, %v902_v44  ;;  %v1012_v45 = vsub.f32 %v3636_v59, %v902_v44  ;;  %v904_v31 = vrot.slane %v903_v20, 4  ;;  %v2419_v26 = vld [vmem:[%s2677_s7 + $0x108] sm:$0xff] }
 0x1ce   : > { %v1275_v6 = vrot.slane %v1274_v54, 1  ;;  %v1286_v51 = vadd.f32 %v1285_v29, %v1284_v8  ;;  %v1573_v13 = vrot.slane %v1572_v27, 4  ;;  %2319 = vpow2.f32 %v1118_v42  ;;  %v2420_v59 = vld [vmem:[%s2677_s7 + $0x128] sm:$0xff] }
 0x1cf   : > { %v2308_v4 = vpop.eup %2307  ;;  %v1114_v60 = vmul.f32 1.442695, %v1008_v48  ;;  %v1122_v28 = vmul.f32 1.442695, %v1012_v45  ;;  %v893_v19 = vmax.f32 %v891_v0, %v892_v24  ;;  %v905_v47 = vmax.f32 %v903_v20, %v904_v31  ;;  %v2421_v45 = vld [vmem:[%s2677_s7 + $0x118] sm:$0xff] }
 0x1d0   : > { %v2310_v57 = vpop.eup %2309  ;;  %v1276_v35 = vadd.f32 %v1275_v6, %v1274_v54  ;;  %v1287_v12 = vrot.slane %v1286_v51, 2  ;;  %v1415_v61 = vmul.f32 %v2419_v26, %v2308_v4  ;;  %v3240_v36 = vadd.f32 %v1573_v13, %v1572_v27  ;;  %v2422_v31 = vld [vmem:[%s2677_s7 + $0x138] sm:$0xff] }
 0x1d1   : > { %v1277_v15 = vadd.f32 %v2310_v57, %v2308_v4  ;;  %v1419_v3 = vmul.f32 %v2420_v59, %v2310_v57  ;;  %2321 = vpow2.f32 %v1114_v60  ;;  %v894_v8 = vrot.slane %v893_v19, 1 }
 0x1d2   : > { %2323 = vrcp.f32 %v1276_v35  ;;  %v1288_v21 = vadd.f32 %v1287_v12, %v1286_v51  ;;  %3642 = vst [vmem:[#allocation14_spill] sm:$0xff] %v3240_v36  ;;  %v2312_v0 = vpop.eup %2311  ;;  %v906_v6 = vrot.slane %v905_v47, 2  ;;  %v910_v4 = vmax.f32 %v3021_v10, %v3042_v22 }
 0x1d3   : > { %v1278_v42 = vrot.slane %v1277_v15, 4  ;;  %v1565_v44 = vadd.f32 %v1419_v3, %v1415_v61  ;;  %2325 = vpow2.f32 %v1122_v28  ;;  %v895_v54 = vmax.f32 %v893_v19, %v894_v8  ;;  %v3242_v29 = vpop.eup %2313 }
 0x1d4   : > { %v1289_v48 = vrot.slane %v1288_v21, 1  ;;  %v1417_v24 = vmul.f32 %v2421_v45, %v2312_v0  ;;  %v2316_v60 = vpop.eup %2315  ;;  %v907_v35 = vmax.f32 %v905_v47, %v906_v6  ;;  %v2423_v45 = vld [vmem:[%s2677_s7 + $0x140] sm:$0xff] }
 0x1d5   : > { %v1279_v51 = vadd.f32 %v1278_v42, %v1277_v15  ;;  %v1566_v27 = vrot.slane %v1565_v44, 4  ;;  %v1007_v20 = vsub.f32 %v3639_v1, %v895_v54  ;;  %v1011_v13 = vsub.f32 %v3638_v32, %v895_v54 }
 0x1d6   : > { %v1291_v19 = vadd.f32 %v2316_v60, %v2312_v0  ;;  %v1421_v57 = vmul.f32 %v2422_v31, %v2316_v60  ;;  %v1290_v26 = vadd.f32 %v1289_v48, %v1288_v21  ;;  %v2424_v0 = vld [vmem:[%s2677_s7 + $0x160] sm:$0xff]  ;;  %v908_v21 = vrot.slane %v907_v35, 1 }
 0x1d7   : > { %v2318_v12 = vpop.eup %2317  ;;  %v1280_v61 = vrot.slane %v1279_v51, 2  ;;  %v1112_v59 = vmul.f32 1.442695, %v1007_v20  ;;  %v1120_v3 = vmul.f32 1.442695, %v1011_v13  ;;  %v3251_v15 = vadd.f32 %v1566_v27, %v1565_v44 }
 0x1d8   : > { %v2320_v8 = vpop.eup %2319  ;;  %v1292_v42 = vrot.slane %v1291_v19, 4  ;;  %v1579_v1 = vadd.f32 %v1421_v57, %v1417_v24  ;;  %v1422_v23 = vmul.f32 %v2423_v45, %v2318_v12  ;;  %v911_v27 = vrot.slane %v910_v4, 4  ;;  %v2426_v45 = vld [vmem:[%s2677_s7 + $0x170] sm:$0xff] }
 0x1d9   : > { %v1281_v32 = vadd.f32 %v1280_v61, %v1279_v51  ;;  %v1298_v54 = vadd.f32 %v2320_v8, %v2318_v12  ;;  %v1426_v28 = vmul.f32 %v2424_v0, %v2320_v8  ;;  %2327 = vpow2.f32 %v1112_v59  ;;  %v2425_v51 = vld [vmem:[%s2677_s7 + $0x150] sm:$0xff] }
 0x1da   : > { %v1293_v60 = vadd.f32 %v1292_v42, %v1291_v19  ;;  %v1580_v47 = vrot.slane %v1579_v1, 4  ;;  %2329 = vpow2.f32 %v1120_v3  ;;  %v909_v57 = vmax.f32 %v907_v35, %v908_v21 }
 0x1db   : > { %v2322_v48 = vpop.eup %2321  ;;  %v1282_v6 = vrot.slane %v1281_v32, 1  ;;  %v1299_v20 = vrot.slane %v1298_v54, 4  ;;  %v1586_v44 = vadd.f32 %v1426_v28, %v1422_v23  ;;  %2331 = vrcp.f32 %v1290_v26 }
 0x1dc   : > { %v3255_v13 = vpop.eup %2323  ;;  %v1294_v24 = vrot.slane %v1293_v60, 2  ;;  %v1424_v31 = vmul.f32 %v2425_v51, %v2322_v48  ;;  %v3258_v59 = vadd.f32 %v1580_v47, %v1579_v1  ;;  %v912_v3 = vmax.f32 %v910_v4, %v911_v27 }
 0x1dd   : > { %v2326_v12 = vpop.eup %2325  ;;  %v1283_v61 = vadd.f32 %v1282_v6, %v1281_v32  ;;  %v1300_v19 = vadd.f32 %v1299_v20, %v1298_v54  ;;  %v1009_v23 = vsub.f32 %v3641_v41, %v909_v57  ;;  %v1587_v7 = vrot.slane %v1586_v44, 4 }
 0x1de   : > { %v1295_v8 = vadd.f32 %v1294_v24, %v1293_v60  ;;  %v1312_v42 = vadd.f32 %v2326_v12, %v2322_v48  ;;  %v1428_v0 = vmul.f32 %v2426_v45, %v2326_v12  ;;  %v1013_v26 = vsub.f32 %v3019_v56, %v909_v57  ;;  %v2427_v57 = vld [vmem:[%s2677_s7 + $0x148] sm:$0xff] }
 0x1df   : > { %2333 = vrcp.f32 %v1283_v61  ;;  %v1301_v28 = vrot.slane %v1300_v19, 2  ;;  %v1116_v21 = vmul.f32 1.442695, %v1009_v23  ;;  %v913_v54 = vrot.slane %v912_v3, 2  ;;  %v2428_v45 = vld [vmem:[%s2677_s7 + $0x168] sm:$0xff] }
 0x1e0   : > { %v1296_v36 = vrot.slane %v1295_v8, 1  ;;  %v1313_v51 = vrot.slane %v1312_v42, 4  ;;  %v1600_v35 = vadd.f32 %v1428_v0, %v1424_v31  ;;  %v1124_v1 = vmul.f32 1.442695, %v1013_v26 }
 0x1e1   : > { %v1302_v32 = vadd.f32 %v1301_v28, %v1300_v19  ;;  %v924_v4 = vmax.f32 %v3028_v17, %v3046_v49  ;;  %2335 = vpow2.f32 %v1116_v21  ;;  %v914_v56 = vmax.f32 %v912_v3, %v913_v54 }
 0x1e2   : > { %v1297_v60 = vadd.f32 %v1296_v36, %v1295_v8  ;;  %v1314_v47 = vadd.f32 %v1313_v51, %v1312_v42  ;;  %v1601_v41 = vrot.slane %v1600_v35, 4  ;;  %2337 = vpow2.f32 %v1124_v1 }
 0x1e3   : > { %v2328_v48 = vpop.eup %2327  ;;  %v1303_v6 = vrot.slane %v1302_v32, 1  ;;  %v925_v20 = vrot.slane %v924_v4, 4  ;;  %v3265_v24 = vadd.f32 %v1587_v7, %v1586_v44  ;;  %v915_v8 = vrot.slane %v914_v56, 1 }
 0x1e4   : > { %v2330_v27 = vpop.eup %2329  ;;  %2339 = vrcp.f32 %v1297_v60  ;;  %v1315_v31 = vrot.slane %v1314_v47, 2  ;;  %v1423_v12 = vmul.f32 %v2427_v57, %v2328_v48  ;;  %v917_v3 = vmax.f32 %v3030_v18, %v3048_v50 }
 0x1e5   : > { %v1304_v61 = vadd.f32 %v1303_v6, %v1302_v32  ;;  %v1305_v19 = vadd.f32 %v2330_v27, %v2328_v48  ;;  %v1427_v36 = vmul.f32 %v2428_v45, %v2330_v27  ;;  %v3269_v42 = vpop.eup %2331  ;;  %v926_v23 = vmax.f32 %v924_v4, %v925_v20 }
 0x1e6   : > { %3643 = vst [vmem:[#allocation10_spill] sm:$0xff] %v3269_v42  ;;  %v1316_v0 = vadd.f32 %v1315_v31, %v1314_v47  ;;  %v931_v28 = vmax.f32 %v3036_v25, %v3053_v2  ;;  %v3275_v7 = vadd.f32 %v1601_v41, %v1600_v35  ;;  %v916_v51 = vmax.f32 %v914_v56, %v915_v8  ;;  %v2429_v8 = vld [vmem:[%s2677_s7 + $0x158] sm:$0xff] }
 0x1e7   : > { %v1306_v44 = vrot.slane %v1305_v19, 4  ;;  %v3277_v26 = vadd.f32 %v1427_v36, %v1423_v12  ;;  %v927_v32 = vrot.slane %v926_v23, 2  ;;  %v918_v1 = vrot.slane %v917_v3, 4 }
 0x1e8   : > { %3644 = vst [vmem:[#allocation15_spill] sm:$0xff] %v3275_v7  ;;  %v1317_v21 = vrot.slane %v1316_v0, 1  ;;  %v932_v54 = vrot.slane %v931_v28, 4  ;;  %2341 = vrcp.f32 %v1304_v61  ;;  %v1014_v47 = vsub.f32 %v3021_v10, %v916_v51 }
 0x1e9   : > { %v3279_v60 = vpop.eup %2333  ;;  %v1307_v4 = vadd.f32 %v1306_v44, %v1305_v19  ;;  %v1018_v48 = vsub.f32 %v3042_v22, %v916_v51  ;;  %v928_v41 = vmax.f32 %v926_v23, %v927_v32  ;;  %v919_v6 = vmax.f32 %v917_v3, %v918_v1  ;;  %v2430_v51 = vld [vmem:[%s2677_s7 + $0x178] sm:$0xff] }
 0x1ea   : > { %v933_v20 = vmax.f32 %v931_v28, %v932_v54  ;;  %v1126_v56 = vmul.f32 1.442695, %v1014_v47  ;;  %v938_v57 = vmax.f32 %v3061_v11, %v3076_v34  ;;  %v1318_v61 = vadd.f32 %v1317_v21, %v1316_v0 }
 0x1eb   : > { %v1308_v27 = vrot.slane %v1307_v4, 2  ;;  %v1134_v31 = vmul.f32 1.442695, %v1018_v48  ;;  %v2336_v12 = vpop.eup %2335  ;;  %v929_v19 = vrot.slane %v928_v41, 1  ;;  %v920_v45 = vrot.slane %v919_v6, 2 }
 0x1ec   : > { %v934_v10 = vrot.slane %v933_v20, 2  ;;  %v2338_v36 = vpop.eup %2337  ;;  %v1425_v44 = vmul.f32 %v2429_v8, %v2336_v12  ;;  %2343 = vpow2.f32 %v1126_v56  ;;  %v939_v23 = vrot.slane %v938_v57, 4 }
 0x1ed   : > { %v1309_v22 = vadd.f32 %v1308_v27, %v1307_v4  ;;  %v1319_v28 = vadd.f32 %v2338_v36, %v2336_v12  ;;  %v1429_v32 = vmul.f32 %v2430_v51, %v2338_v36  ;;  %2345 = vpow2.f32 %v1134_v31 }
 0x1ee   : > { %v3287_v3 = vpop.eup %2339  ;;  %v930_v1 = vmax.f32 %v928_v41, %v929_v19  ;;  %v921_v47 = vmax.f32 %v919_v6, %v920_v45  ;;  %v935_v48 = vmax.f32 %v933_v20, %v934_v10  ;;  %v940_v0 = vmax.f32 %v938_v57, %v939_v23 }
 0x1ef   : > { %v1310_v54 = vrot.slane %v1309_v22, 1  ;;  %v1320_v21 = vrot.slane %v1319_v28, 4  ;;  %v3290_v35 = vadd.f32 %v1429_v32, %v1425_v44  ;;  %2347 = vrcp.f32 %v1318_v61 }
 0x1f0   : > { %v1016_v4 = vsub.f32 %v3028_v17, %v930_v1  ;;  %v1020_v27 = vsub.f32 %v3046_v49, %v930_v1  ;;  %v922_v8 = vrot.slane %v921_v47, 1  ;;  %v936_v42 = vrot.slane %v935_v48, 1 }
 0x1f1   : > { %v1311_v56 = vadd.f32 %v1310_v54, %v1309_v22  ;;  %v941_v7 = vrot.slane %v940_v0, 2  ;;  %v1321_v12 = vadd.f32 %v1320_v21, %v1319_v28  ;;  %v952_v17 = vmax.f32 %v3064_v40, %v3081_v53  ;;  %v2432_v21 = vld [vmem:[%s2677_s7 + $0x1a0] sm:$0xff] }
 0x1f2   : > { %v1130_v36 = vmul.f32 1.442695, %v1016_v4  ;;  %v1138_v31 = vmul.f32 1.442695, %v1020_v27  ;;  %v3294_v41 = vpop.eup %2341  ;;  %v923_v6 = vmax.f32 %v921_v47, %v922_v8  ;;  %v937_v20 = vmax.f32 %v935_v48, %v936_v42 }
 0x1f3   : > { %2349 = vrcp.f32 %v1311_v56  ;;  %v942_v57 = vmax.f32 %v940_v0, %v941_v7  ;;  %v1322_v19 = vrot.slane %v1321_v12, 2  ;;  %v945_v49 = vmax.f32 %v3066_v63, %v3083_v33 }
 0x1f4   : > { %2351 = vpow2.f32 %v1130_v36  ;;  %v1015_v61 = vsub.f32 %v3030_v18, %v923_v6  ;;  %v1019_v45 = vsub.f32 %v3048_v50, %v923_v6  ;;  %v1017_v10 = vsub.f32 %v3036_v25, %v937_v20  ;;  %v2431_v18 = vld [vmem:[%s2677_s7 + $0x180] sm:$0xff] }
 0x1f5   : > { %2353 = vpow2.f32 %v1138_v31  ;;  %v1323_v22 = vadd.f32 %v1322_v19, %v1321_v12  ;;  %v1021_v42 = vsub.f32 %v3053_v2, %v937_v20  ;;  %v943_v7 = vrot.slane %v942_v57, 1 }
 0x1f6   : > { %v953_v44 = vrot.slane %v952_v17, 4  ;;  %v2344_v23 = vpop.eup %2343  ;;  %v1128_v28 = vmul.f32 1.442695, %v1015_v61  ;;  %v1136_v51 = vmul.f32 1.442695, %v1019_v45  ;;  %v959_v1 = vmax.f32 %v3070_v9, %v3096_v39 }
 0x1f7   : > { %v1132_v32 = vmul.f32 1.442695, %v1017_v10  ;;  %v2346_v54 = vpop.eup %2345  ;;  %v1324_v47 = vrot.slane %v1323_v22, 1  ;;  %v1430_v48 = vmul.f32 %v2431_v18, %v2344_v23  ;;  %v1140_v50 = vmul.f32 1.442695, %v1021_v42 }
 0x1f8   : > { %v944_v0 = vmax.f32 %v942_v57, %v943_v7  ;;  %v1326_v25 = vadd.f32 %v2346_v54, %v2344_v23  ;;  %v1434_v4 = vmul.f32 %v2432_v21, %v2346_v54  ;;  %2355 = vpow2.f32 %v1128_v28  ;;  %v2433_v23 = vld [vmem:[%s2677_s7 + $0x190] sm:$0xff] }
 0x1f9   : > { %v954_v2 = vmax.f32 %v952_v17, %v953_v44  ;;  %v1325_v27 = vadd.f32 %v1324_v47, %v1323_v22  ;;  %2357 = vpow2.f32 %v1136_v51  ;;  %v3312_v6 = vpop.eup %2347  ;;  %v946_v19 = vrot.slane %v945_v49, 4  ;;  %v2434_v54 = vld [vmem:[%s2677_s7 + $0x1b0] sm:$0xff] }
 0x1fa   : > { %v1022_v56 = vsub.f32 %v3061_v11, %v944_v0  ;;  %v1026_v8 = vsub.f32 %v3076_v34, %v944_v0  ;;  %v1327_v12 = vrot.slane %v1326_v25, 4  ;;  %v3310_v36 = vadd.f32 %v1434_v4, %v1430_v48 }
 0x1fb   : > { %2359 = vpow2.f32 %v1132_v32  ;;  %v955_v31 = vrot.slane %v954_v2, 2  ;;  %v1608_v17 = vrot.slane %v3290_v35, 4  ;;  %v947_v22 = vmax.f32 %v945_v49, %v946_v19 }
 0x1fc   : > { %2361 = vrcp.f32 %v1325_v27  ;;  %v1142_v20 = vmul.f32 1.442695, %v1022_v56  ;;  %v1150_v57 = vmul.f32 1.442695, %v1026_v8  ;;  %v1328_v11 = vadd.f32 %v1327_v12, %v1326_v25 }
 0x1fd   : > { %v3314_v61 = vpop.eup %2349  ;;  %2363 = vpow2.f32 %v1140_v50  ;;  %v956_v34 = vmax.f32 %v954_v2, %v955_v31  ;;  %v1615_v10 = vrot.slane %v3310_v36, 4  ;;  %v960_v42 = vrot.slane %v959_v1, 4 }
 0x1fe   : > { %v2352_v45 = vpop.eup %2351  ;;  %2365 = vpow2.f32 %v1142_v20  ;;  %v1329_v44 = vrot.slane %v1328_v11, 2  ;;  %v948_v18 = vrot.slane %v947_v22, 2  ;;  %v3645_v25 = vrot.slane %v3034_v30, 1 }
 0x1ff   : > { %v2354_v7 = vpop.eup %2353  ;;  %v1432_v28 = vmul.f32 %v2433_v23, %v2352_v45  ;;  %2367 = vpow2.f32 %v1150_v57  ;;  %v957_v51 = vrot.slane %v956_v34, 1  ;;  %v961_v48 = vmax.f32 %v959_v1, %v960_v42 }
 0x200   : > { %v1340_v32 = vadd.f32 %v2354_v7, %v2352_v45  ;;  %v1436_v47 = vmul.f32 %v2434_v54, %v2354_v7  ;;  %v1330_v50 = vadd.f32 %v1329_v44, %v1328_v11  ;;  %v3323_v21 = vadd.f32 %v3645_v25, %v3034_v30  ;;  %v2435_v11 = vld [vmem:[%s2677_s7 + $0x188] sm:$0xff] }
 0x201   : > { %v958_v0 = vmax.f32 %v956_v34, %v957_v51  ;;  %v1514_v49 = vrot.slane %v3169_v55, 1  ;;  %v949_v27 = vmax.f32 %v947_v22, %v948_v18  ;;  %v3646_v56 = vrot.slane %v3114_v43, 1  ;;  %v2436_v44 = vld [vmem:[%s2677_s7 + $0x1a8] sm:$0xff]  ;;  %v2437_v51 = vld [vmem:[%s2677_s7 + $0x198] sm:$0xff] }
 0x202   : > { %v1341_v4 = vrot.slane %v1340_v32, 4  ;;  %v3326_v2 = vadd.f32 %v1436_v47, %v1432_v28  ;;  %v2356_v1 = vpop.eup %2355  ;;  %v1331_v12 = vrot.slane %v1330_v50, 1  ;;  %v962_v30 = vrot.slane %v961_v48, 2 }
 0x203   : > { %v3331_v8 = vadd.f32 %v3646_v56, %v3114_v43  ;;  %v1024_v31 = vsub.f32 %v3064_v40, %v958_v0  ;;  %v1028_v20 = vsub.f32 %v3081_v53, %v958_v0  ;;  %v2358_v57 = vpop.eup %2357  ;;  %v1431_v34 = vmul.f32 %v2435_v11, %v2356_v1  ;;  %v2439_v43 = vld [vmem:[%s2677_s7 + $0x1c0] sm:$0xff] }
 0x204   : > { %v1342_v19 = vadd.f32 %v1341_v4, %v1340_v32  ;;  %v950_v45 = vrot.slane %v949_v27, 1  ;;  %v3337_v22 = vadd.f32 %v1514_v49, %v3169_v55  ;;  %v1333_v7 = vadd.f32 %v2358_v57, %v2356_v1 }
 0x205   : > { %v2360_v42 = vpop.eup %2359  ;;  %v1435_v23 = vmul.f32 %v2436_v44, %v2358_v57  ;;  %v1146_v40 = vmul.f32 1.442695, %v1024_v31  ;;  %v1154_v32 = vmul.f32 1.442695, %v1028_v20  ;;  %v1332_v0 = vadd.f32 %v1331_v12, %v1330_v50  ;;  %v2438_v57 = vld [vmem:[%s2677_s7 + $0x1b8] sm:$0xff] }
 0x206   : > { %v3341_v28 = vpop.eup %2361  ;;  %v1343_v53 = vrot.slane %v1342_v19, 2  ;;  %v1433_v54 = vmul.f32 %v2437_v51, %v2360_v42  ;;  %v951_v47 = vmax.f32 %v949_v27, %v950_v45  ;;  %v1334_v55 = vrot.slane %v1333_v7, 4 }
 0x207   : > { %v2364_v18 = vpop.eup %2363  ;;  %v3344_v25 = vadd.f32 %v1435_v23, %v1431_v34  ;;  %v963_v49 = vmax.f32 %v961_v48, %v962_v30  ;;  %2369 = vpow2.f32 %v1146_v40  ;;  %v2440_v30 = vld [vmem:[%s2677_s7 + $0x1e0] sm:$0xff] }
 0x208   : > { %v2366_v4 = vpop.eup %2365  ;;  %v1344_v56 = vadd.f32 %v1343_v53, %v1342_v19  ;;  %v1347_v1 = vadd.f32 %v2364_v18, %v2360_v42  ;;  %v1437_v31 = vmul.f32 %v2438_v57, %v2364_v18  ;;  %v1335_v44 = vadd.f32 %v1334_v55, %v1333_v7 }
 0x209   : > { %v2368_v11 = vpop.eup %2367  ;;  %v1438_v51 = vmul.f32 %v2439_v43, %v2366_v4  ;;  %2371 = vpow2.f32 %v1154_v32  ;;  %v1023_v27 = vsub.f32 %v3066_v63, %v951_v47  ;;  %v1027_v45 = vsub.f32 %v3083_v33, %v951_v47 }
 0x20a   : > { %v1345_v20 = vrot.slane %v1344_v56, 1  ;;  %v1348_v50 = vrot.slane %v1347_v1, 4  ;;  %v3349_v12 = vadd.f32 %v1437_v31, %v1433_v54  ;;  %v1354_v34 = vadd.f32 %v2368_v11, %v2366_v4 }
 0x20b   : > { %v1336_v48 = vrot.slane %v1335_v44, 2  ;;  %v1442_v19 = vmul.f32 %v2440_v30, %v2368_v11  ;;  %v1144_v42 = vmul.f32 1.442695, %v1023_v27  ;;  %v964_v7 = vrot.slane %v963_v49, 1 }
 0x20c   : > { %v1346_v23 = vadd.f32 %v1345_v20, %v1344_v56  ;;  %v1349_v40 = vadd.f32 %v1348_v50, %v1347_v1  ;;  %v1355_v53 = vrot.slane %v1354_v34, 4  ;;  %v1152_v63 = vmul.f32 1.442695, %v1027_v45 }
 0x20d   : > { %v1337_v18 = vadd.f32 %v1336_v48, %v1335_v44  ;;  %v3353_v43 = vadd.f32 %v1442_v19, %v1438_v51  ;;  %2373 = vpow2.f32 %v1144_v42  ;;  %v965_v55 = vmax.f32 %v963_v49, %v964_v7 }
 0x20e   : > { %2375 = vrcp.f32 %v1332_v0  ;;  %v1350_v32 = vrot.slane %v1349_v40, 2  ;;  %v1356_v54 = vadd.f32 %v1355_v53, %v1354_v34  ;;  %v3647_v57 = vrot.slane %v3200_v58, 2 }
 0x20f   : > { %v1338_v4 = vrot.slane %v1337_v18, 1  ;;  %2377 = vpow2.f32 %v1152_v63  ;;  %v1568_v47 = vrot.slane %v3251_v15, 2  ;;  %v1025_v31 = vsub.f32 %v3070_v9, %v965_v55  ;;  %v2441_v9 = vld [vmem:[%s2677_s7 + $0x1d0] sm:$0xff] }
 0x210   : > { %v1541_v33 = vadd.f32 %v3647_v57, %v3200_v58  ;;  %v1351_v56 = vadd.f32 %v1350_v32, %v1349_v40  ;;  %v1357_v1 = vrot.slane %v1356_v54, 2  ;;  %v1029_v11 = vsub.f32 %v3096_v39, %v965_v55 }
 0x211   : > { %2379 = vrcp.f32 %v1346_v23  ;;  %v1569_v49 = vadd.f32 %v1568_v47, %v3251_v15  ;;  %v3648_v44 = vrot.slane %v3277_v26, 4  ;;  %v2370_v27 = vpop.eup %2369  ;;  %v1339_v58 = vadd.f32 %v1338_v4, %v1337_v18  ;;  %v2442_v15 = vld [vmem:[%s2677_s7 + $0x1f0] sm:$0xff] }
 0x212   : > { %v1542_v0 = vrot.slane %v1541_v33, 1  ;;  %v1352_v20 = vrot.slane %v1351_v56, 1  ;;  %v1148_v50 = vmul.f32 1.442695, %v1025_v31  ;;  %v1156_v34 = vmul.f32 1.442695, %v1029_v11 }
 0x213   : > { %v1595_v51 = vadd.f32 %v3648_v44, %v3277_v26  ;;  %v2372_v48 = vpop.eup %2371  ;;  %v3365_v30 = vadd.f32 %v1357_v1, %v1356_v54  ;;  %v1440_v19 = vmul.f32 %v2441_v9, %v2370_v27  ;;  %v1570_v39 = vrot.slane %v1569_v49, 1  ;;  %v2443_v1 = vld [vmem:[%s2677_s7 + $0x1c8] sm:$0xff] }
 0x214   : > { %v3368_v42 = vadd.f32 %v1352_v20, %v1351_v56  ;;  %v1368_v23 = vadd.f32 %v2372_v48, %v2370_v27  ;;  %v1444_v40 = vmul.f32 %v2442_v15, %v2372_v48  ;;  %v1543_v53 = vadd.f32 %v1542_v0, %v1541_v33  ;;  %v3649_v11 = vld [vmem:[#allocation5_spill] sm:$0xff] }
 0x215   : > { %v1596_v45 = vrot.slane %v1595_v51, 2  ;;  %2381 = vpow2.f32 %v1148_v50  ;;  %v1571_v26 = vadd.f32 %v1570_v39, %v1569_v49  ;;  %v1622_v18 = vrot.slane %v3344_v25, 4 }
 0x216   : > { %v1369_v63 = vrot.slane %v1368_v23, 4  ;;  %v3372_v32 = vadd.f32 %v1444_v40, %v1440_v19  ;;  %2383 = vpow2.f32 %v1156_v34  ;;  %v1703_v54 = vmul.f32 %v3087_v46, %v3323_v21 }
 0x217   : > { %v1597_v7 = vadd.f32 %v1596_v45, %v1595_v51  ;;  %v2374_v55 = vpop.eup %2373  ;;  %v1623_v57 = vadd.f32 %v1622_v18, %v3344_v25  ;;  %2385 = vrcp.f32 %v1339_v58  ;;  %v1707_v33 = vmul.f32 %v3136_v52, %v3331_v8  ;;  %v2444_v52 = vld [vmem:[%s2677_s7 + $0x1e8] sm:$0xff]  ;;  %v3652_v18 = vld [vmem:[#allocation27_spill] sm:$0xff] }
 0x218   : > { %v3379_v47 = vpop.eup %2375  ;;  %v1370_v56 = vadd.f32 %v1369_v63, %v1368_v23  ;;  %v1439_v31 = vmul.f32 %v2443_v1, %v2374_v55  ;;  %v1711_v0 = vmul.f32 %v3649_v11, %v3337_v22  ;;  %v1715_v49 = vmul.f32 %v3231_v37, %v1543_v53  ;;  %v3650_v53 = vld [vmem:[#allocation19_spill] sm:$0xff] }
 0x219   : > { %v1598_v4 = vrot.slane %v1597_v7, 1  ;;  %v2378_v46 = vpop.eup %2377  ;;  %v1359_v21 = vrot.slane %v3365_v30, 1  ;;  %v1624_v25 = vrot.slane %v1623_v57, 2  ;;  %v1719_v51 = vmul.f32 %v3279_v60, %v1571_v26 }
 0x21a   : > { %v1371_v27 = vrot.slane %v1370_v56, 2  ;;  %v1361_v58 = vadd.f32 %v2378_v46, %v2374_v55  ;;  %v1443_v8 = vmul.f32 %v2444_v52, %v2378_v46  ;;  %v1794_v60 = vsel %vm1780_vm0, %v1707_v33, %v1703_v54 }
 0x21b   : > { %v1599_v44 = vadd.f32 %v1598_v4, %v1597_v7  ;;  %v3388_v20 = vpop.eup %2379  ;;  %v1625_v50 = vadd.f32 %v1624_v25, %v1623_v57  ;;  %v3651_v26 = vrot.slane %v3650_v53, 1  ;;  %v3653_v63 = vrot.slane %v3652_v18, 1 }
 0x21c   : > { %v3391_v37 = vadd.f32 %v1371_v27, %v1370_v56  ;;  %v1362_v22 = vrot.slane %v1361_v58, 4  ;;  %v1649_v48 = vadd.f32 %v1443_v8, %v1439_v31  ;;  %v2445_v56 = vld [vmem:[%s2677_s7 + $0x1d8] sm:$0xff]  ;;  %v3655_v8 = vrot.slane %v3205_v16, 2 }
 0x21d   : > { %v1723_v34 = vmul.f32 %v3314_v61, %v1599_v44  ;;  %v1626_v9 = vrot.slane %v1625_v50, 1  ;;  %v1795_v61 = vsel %vm1782_vm1, %v1711_v0, %v1794_v60  ;;  %v1473_v7 = vadd.f32 %v3651_v26, %v3650_v53  ;;  %v2446_v0 = vld [vmem:[%s2677_s7 + $0x1f8] sm:$0xff]  ;;  %v3654_v44 = vld [vmem:[#allocation8_spill] sm:$0xff] }
 0x21e   : > { %v1373_v19 = vrot.slane %v3391_v37, 1  ;;  %v1363_v39 = vadd.f32 %v1362_v22, %v1361_v58  ;;  %v1650_v45 = vrot.slane %v1649_v48, 4  ;;  %v1796_v40 = vsel %vm1784_vm2, %v1715_v49, %v1795_v61 }
 0x21f   : > { %v2382_v23 = vpop.eup %2381  ;;  %v1627_v15 = vadd.f32 %v1626_v9, %v1625_v50  ;;  %v1501_v55 = vadd.f32 %v3653_v63, %v3652_v18  ;;  %v1797_v33 = vsel %vm1786_vm3, %v1719_v51, %v1796_v40  ;;  %v1528_v25 = vrot.slane %v3654_v44, 1 }
 0x220   : > { %v2384_v54 = vpop.eup %2383  ;;  %v1364_v4 = vrot.slane %v1363_v39, 2  ;;  %v1651_v57 = vadd.f32 %v1650_v45, %v1649_v48  ;;  %v1441_v1 = vmul.f32 %v2445_v56, %v2382_v23  ;;  %v1798_v49 = vsel %vm1788_vm4, %v1723_v34, %v1797_v33  ;;  %v3656_v33 = vld [vmem:[#allocation22_spill] sm:$0xff] }
 0x221   : > { %v2386_v31 = vpop.eup %2385  ;;  %v1375_v11 = vadd.f32 %v2384_v54, %v2382_v23  ;;  %v1445_v46 = vmul.f32 %v2446_v0, %v2384_v54  ;;  %v1555_v50 = vadd.f32 %v3655_v8, %v3205_v16  ;;  %v1529_v51 = vadd.f32 %v1528_v25, %v3654_v44  ;;  %v3657_v44 = vld [vmem:[#allocation7_spill] sm:$0xff] }
 0x222   : > { %v1365_v27 = vadd.f32 %v1364_v4, %v1363_v39  ;;  %v1652_v58 = vrot.slane %v1651_v57, 2  ;;  %v1727_v52 = vmul.f32 %v2386_v31, %v1627_v15  ;;  %v1582_v48 = vrot.slane %v3258_v59, 2 }
 0x223   : > { %v1376_v22 = vrot.slane %v1375_v11, 4  ;;  %v1609_v9 = vadd.f32 %v1608_v17, %v3290_v35  ;;  %v1556_v39 = vrot.slane %v1555_v50, 1  ;;  %v1636_v16 = vrot.slane %v3349_v12, 4 }
 0x224   : > { %v1366_v60 = vrot.slane %v1365_v27, 1  ;;  %v1653_v34 = vadd.f32 %v1652_v58, %v1651_v57  ;;  %v3417_v45 = vsel %vm1790_vm5, %v1727_v52, %v1798_v49  ;;  %v1583_v23 = vadd.f32 %v1582_v48, %v3258_v59 }
 0x225   : > { %v1377_v61 = vadd.f32 %v1376_v22, %v1375_v11  ;;  %v1610_v15 = vrot.slane %v1609_v9, 2  ;;  %v1557_v26 = vadd.f32 %v1556_v39, %v1555_v50  ;;  %v1663_v18 = vadd.f32 %v1445_v46, %v1441_v1 }
 0x226   : > { %v1367_v40 = vadd.f32 %v1366_v60, %v1365_v27  ;;  %v1654_v53 = vrot.slane %v1653_v34, 1  ;;  %v1584_v54 = vrot.slane %v1583_v23, 1  ;;  %v1637_v35 = vadd.f32 %v1636_v16, %v3349_v12 }
 0x227   : > { %v1378_v63 = vrot.slane %v1377_v61, 2  ;;  %v1611_v4 = vadd.f32 %v1610_v15, %v1609_v9  ;;  %v1664_v57 = vrot.slane %v1663_v18, 4  ;;  %v1705_v56 = vmul.f32 %v3656_v33, %v1473_v7  ;;  %v3658_v9 = vld [vmem:[#allocation28_spill] sm:$0xff]  ;;  %v3665_v33 = vld [vmem:[#allocation25_spill] sm:$0xff] }
 0x228   : > { %v1655_v17 = vadd.f32 %v1654_v53, %v1653_v34  ;;  %2387 = vrcp.f32 %v1367_v40  ;;  %v1585_v11 = vadd.f32 %v1584_v54, %v1583_v23  ;;  %v1638_v0 = vrot.slane %v1637_v35, 2 }
 0x229   : > { %v1379_v31 = vadd.f32 %v1378_v63, %v1377_v61  ;;  %v1612_v59 = vrot.slane %v1611_v4, 1  ;;  %v1665_v49 = vadd.f32 %v1664_v57, %v1663_v18  ;;  %2389 = vrcp.f32 %v3368_v42  ;;  %v3664_v57 = vld [vmem:[#allocation23_spill] sm:$0xff] }
 0x22a   : > { %v1709_v1 = vmul.f32 %v3657_v44, %v1501_v55  ;;  %v1713_v46 = vmul.f32 %v3198_v62, %v1529_v51  ;;  %v1639_v12 = vadd.f32 %v1638_v0, %v1637_v35  ;;  %v1717_v58 = vmul.f32 %v3242_v29, %v1557_v26 }
 0x22b   : > { %v1380_v25 = vrot.slane %v1379_v31, 1  ;;  %v1613_v27 = vadd.f32 %v1612_v59, %v1611_v4  ;;  %v1666_v52 = vrot.slane %v1665_v49, 2  ;;  %v1721_v7 = vmul.f32 %v3287_v3, %v1585_v11  ;;  %v3660_v3 = vld [vmem:[#allocation9_spill] sm:$0xff]  ;;  %v3663_v4 = vld [vmem:[#allocation20_spill] sm:$0xff] }
 0x22c   : > { %v1808_v8 = vsel %vm1780_vm0, %v1709_v1, %v1705_v56  ;;  %v1360_v50 = vadd.f32 %v1359_v21, %v3365_v30  ;;  %v1640_v42 = vrot.slane %v1639_v12, 1  ;;  %v3659_v29 = vrot.slane %v3658_v9, 1 }
 0x22d   : > { %v1381_v22 = vadd.f32 %v1380_v25, %v1379_v31  ;;  %v1725_v55 = vmul.f32 %v3341_v28, %v1613_v27  ;;  %v1809_v62 = vsel %vm1782_vm1, %v1713_v46, %v1808_v8  ;;  %v1667_v51 = vadd.f32 %v1666_v52, %v1665_v49 }
 0x22e   : > { %v1810_v48 = vsel %vm1784_vm2, %v1717_v58, %v1809_v62  ;;  %v1508_v60 = vadd.f32 %v3659_v29, %v3658_v9  ;;  %v1535_v34 = vrot.slane %v3660_v3, 1  ;;  %v1641_v39 = vadd.f32 %v1640_v42, %v1639_v12  ;;  %v3667_v42 = vld [vmem:[#allocation29_spill] sm:$0xff] }
 0x22f   : > { %2391 = vrcp.f32 %v1381_v22  ;;  %v1811_v61 = vsel %vm1786_vm3, %v1721_v7, %v1810_v48  ;;  %v3661_v30 = vrot.slane %v3233_v38, 2  ;;  %v1668_v28 = vrot.slane %v1667_v51, 1 }
 0x230   : > { %v1812_v23 = vsel %vm1788_vm4, %v1725_v55, %v1811_v61  ;;  %v1536_v15 = vadd.f32 %v1535_v34, %v3660_v3  ;;  %v1589_v16 = vrot.slane %v3265_v24, 2  ;;  %v1616_v53 = vadd.f32 %v1615_v10, %v3310_v36  ;;  %v3666_v10 = vld [vmem:[#allocation4_spill] sm:$0xff] }
 0x231   : > { %v1562_v21 = vadd.f32 %v3661_v30, %v3233_v38  ;;  %v1643_v26 = vrot.slane %v3353_v43, 4  ;;  %2393 = vrcp.f32 %v1360_v50  ;;  %v1669_v63 = vadd.f32 %v1668_v28, %v1667_v51  ;;  %v3662_v38 = vld [vmem:[#allocation17_spill] sm:$0xff] }
 0x232   : > { %v2388_v18 = vpop.eup %2387  ;;  %v1590_v54 = vadd.f32 %v1589_v16, %v3265_v24  ;;  %v1702_v35 = vmul.f32 %v3663_v4, %v3662_v38  ;;  %v1706_v56 = vmul.f32 %v3665_v33, %v3664_v57  ;;  %v1617_v59 = vrot.slane %v1616_v53, 2  ;;  %v3673_v4 = vld [vmem:[#allocation18_spill] sm:$0xff]  ;;  %v3675_v57 = vld [vmem:[#allocation24_spill] sm:$0xff] }
 0x233   : > { %v1563_v40 = vrot.slane %v1562_v21, 1  ;;  %v1731_v31 = vmul.f32 %v2388_v18, %v1655_v17  ;;  %v1644_v0 = vadd.f32 %v1643_v26, %v3353_v43  ;;  %v2390_v49 = vpop.eup %2389  ;;  %v1710_v44 = vmul.f32 %v3666_v10, %v1508_v60  ;;  %v3671_v60 = vld [vmem:[#allocation15_spill] sm:$0xff]  ;;  %v3676_v33 = vld [vmem:[#allocation26_spill] sm:$0xff]  ;;  %v1734_v10 = vld [vmem:[%s3563_s2] sm:$0xff] }
 0x234   : > { %v1591_v36 = vrot.slane %v1590_v54, 1  ;;  %v1714_v1 = vmul.f32 %v3217_v14, %v1536_v15  ;;  %v1781_v46 = vsel %vm1780_vm0, %v1706_v56, %v1702_v35  ;;  %v1729_v25 = vmul.f32 %v2390_v49, %v1641_v39  ;;  %v3678_v49 = vld [vmem:[#allocation6_spill] sm:$0xff] }
 0x235   : > { %v1564_v11 = vadd.f32 %v1563_v40, %v1562_v21  ;;  %v1800_v24 = vsel %vm1792_vm6, %v1731_v31, %v3417_v45  ;;  %v1618_v27 = vadd.f32 %v1617_v59, %v1616_v53  ;;  %v1645_v12 = vrot.slane %v1644_v0, 2  ;;  %v3677_v59 = vld [vmem:[#allocation30_spill] sm:$0xff] }
 0x236   : > { %1826 = vmatprep.subr.mxu0 %v1800_v24  ;;  %v1592_v17 = vadd.f32 %v1591_v36, %v1590_v54  ;;  %v1783_v43 = vsel %vm1782_vm1, %v1710_v44, %v1781_v46  ;;  %v1374_v52 = vadd.f32 %v1373_v19, %v3391_v37  ;;  %v1813_v14 = vsel %vm1790_vm5, %v1729_v25, %v1812_v23  ;;  %v3669_v37 = vld [vmem:[#allocation14_spill] sm:$0xff]  ;;  %v1736_v25 = vld [vmem:[%s3564_s3] sm:$0xff] }
 0x237   : > { %v1718_v58 = vmul.f32 %v3255_v13, %v1564_v11  ;;  %v1619_v7 = vrot.slane %v1618_v27, 1  ;;  %v1646_v8 = vadd.f32 %v1645_v12, %v1644_v0  ;;  %v1785_v50 = vsel %vm1784_vm2, %v1714_v1, %v1783_v43  ;;  %v3679_v1 = vld [vmem:[#allocation10_spill] sm:$0xff] }
 0x238   : > { %v1722_v45 = vmul.f32 %v3294_v41, %v1592_v17  ;;  %v3668_v55 = vrot.slane %v3667_v42, 1  ;;  %v1549_v62 = vrot.slane %v3203_v5, 1  ;;  %v3670_v19 = vrot.slane %v3669_v37, 2 }
 0x239   : > { %v1787_v22 = vsel %vm1786_vm3, %v1718_v58, %v1785_v50  ;;  %v2392_v51 = vpop.eup %2391  ;;  %v1620_v48 = vadd.f32 %v1619_v7, %v1618_v27  ;;  %v1647_v9 = vrot.slane %v1646_v8, 1  ;;  %v1603_v3 = vrot.slane %v3671_v60, 2 }
 0x23a   : > { %v1522_v13 = vadd.f32 %v3668_v55, %v3667_v42  ;;  %v1576_v29 = vadd.f32 %v3670_v19, %v3669_v37  ;;  %v1733_v34 = vmul.f32 %v2392_v51, %v1669_v63  ;;  %v1789_v41 = vsel %vm1788_vm4, %v1722_v45, %v1787_v22  ;;  %v1737_v22 = vld [vmem:[%s3564_s3 + $0x8] sm:$0xff] }
 0x23b   : > { %v1550_v39 = vadd.f32 %v1549_v62, %v3203_v5  ;;  %v3672_v61 = vrot.slane %v3326_v2, 4  ;;  %v2394_v21 = vpop.eup %2393  ;;  %v1648_v28 = vadd.f32 %v1647_v9, %v1646_v8  ;;  %v1726_v23 = vmul.f32 %v3379_v47, %v1620_v48  ;;  %v3674_v47 = vld [vmem:[#allocation21_spill] sm:$0xff] }
 0x23c   : > { %v1577_v15 = vrot.slane %v1576_v29, 1  ;;  %v1604_v16 = vadd.f32 %v1603_v3, %v3671_v60  ;;  %v1814_v40 = vsel %vm1792_vm6, %v1733_v34, %v1813_v14  ;;  %v1657_v26 = vrot.slane %v3372_v32, 4  ;;  %v1735_v8 = vld [vmem:[%s3563_s2 + $0x8] sm:$0xff] }
 0x23d   : > { %v1630_v30 = vadd.f32 %v3672_v61, %v3326_v2  ;;  %2395 = vrcp.f32 %v1374_v52  ;;  %1903 = vmatprep.subr.mxu1 %v1814_v40  ;;  %v1730_v18 = vmul.f32 %v2394_v21, %v1648_v28  ;;  %v1791_v5 = vsel %vm1790_vm5, %v1726_v23, %v1789_v41 }
 0x23e   : > { %v1578_v63 = vadd.f32 %v1577_v15, %v1576_v29  ;;  %v1605_v54 = vrot.slane %v1604_v16, 1  ;;  %v1658_v38 = vadd.f32 %v1657_v26, %v3372_v32  ;;  %v1704_v35 = vmul.f32 %v3674_v47, %v3673_v4 }
 0x23f   : > { %v1631_v53 = vrot.slane %v1630_v30, 2  ;;  %v1708_v56 = vmul.f32 %v3676_v33, %v3675_v57  ;;  %v1793_v31 = vsel %vm1792_vm6, %v1730_v18, %v1791_v5  ;;  %v1712_v0 = vmul.f32 %v3677_v59, %v1522_v13 }
 0x240   : > { %v1606_v11 = vadd.f32 %v1605_v54, %v1604_v16  ;;  %v1716_v36 = vmul.f32 %v3678_v49, %v1550_v39  ;;  %1827 = vmatpush1.msra.mxu0 %v1793_v31  ;;  %v1659_v32 = vrot.slane %v1658_v38, 2  ;;  %v1720_v46 = vmul.f32 %v3679_v1, %v1578_v63 }
 0x241   : > { %v1632_v2 = vadd.f32 %v1631_v53, %v1630_v30  ;;  %v1801_v24 = vsel %vm1780_vm0, %v1708_v56, %v1704_v35  ;;  %2103 = vmatmul.mubr.msk.f32.vlgmr.msra.gmra.mrb[32].mxu0 %vm1819_vm7, %v1734_v10  ;;  %v2472_v52 = vmov 0   ;;  %v3680_v7 = vmov 0.0  }
 0x242   : > { %v1724_v27 = vmul.f32 %v3312_v6, %v1606_v11  ;;  %v1802_v12 = vsel %vm1782_vm1, %v1712_v0, %v1801_v24  ;;  %v1660_v58 = vadd.f32 %v1659_v32, %v1658_v38  ;;  %2204 = vset.pattern.permute.xlu0 %v2472_v52  ;;  %1896 = vmatprep.mubr.f32.mxu0 %v3680_v7 }
 0x243   : > { %v1633_v44 = vrot.slane %v1632_v2, 1  ;;  %v1803_v43 = vsel %vm1784_vm2, %v1716_v36, %v1802_v12  ;;  %1740 = vperm.xlu0 %2204, %v1736_v25  }
 0x244   : > { %v1804_v14 = vsel %vm1786_vm3, %v1720_v46, %v1803_v43  ;;  %v1661_v6 = vrot.slane %v1660_v58, 1 }
 0x245   : > { %v1634_v17 = vadd.f32 %v1633_v44, %v1632_v2  ;;  %v1805_v45 = vsel %vm1788_vm4, %v1724_v27, %v1804_v14  ;;  %2104 = vmatmul.mubr.msk.f32.gmra.mrb[34].mxu0 %vm1819_vm7, %v1735_v8 }
 0x246   : > { %v1662_v55 = vadd.f32 %v1661_v6, %v1660_v58 }
 0x247   : > { %v1728_v50 = vmul.f32 %v3388_v20, %v1634_v17  ;;  %v2396_v42 = vpop.eup %2395  ;;  %1745 = vperm.xlu0 %2204, %v1737_v22  }
 0x248   : > { %v1732_v62 = vmul.f32 %v2396_v42, %v1662_v55 }
 0x249   : > { %v1806_v13 = vsel %vm1790_vm5, %v1728_v50, %v1805_v45 }
 0x24a   : > { %v1807_v51 = vsel %vm1792_vm6, %v1732_v62, %v1806_v13 }
 0x24b   : > { %1904 = vmatpush1.msra.mxu1 %v1807_v51 }
 0x24c   : > { %2105 = vmatmul.mubr.msk.f32.vlgmr.msra.gmra.mrb[32].mxu1 %vm1819_vm7, %v1734_v10 }
 0x24d   : > { %1973 = vmatprep.mubr.f32.mxu1 %v3680_v7 }
 0x250   : > { %2106 = vmatmul.mubr.msk.f32.gmra.mrb[34].mxu1 %vm1819_vm7, %v1735_v8 }
 0x2c2   : > { %v1741_v20 = vpop.permute.xlu0 %1740 }
 0x2c6   : > { %v1746_v34 = vpop.permute.xlu0 %1745 }
 0x314   : > { %v1892_v48 = vpop.f32.mrb[32].mxu0 }
 0x315   : > { %v1893_v9 = vadd.f32 %v1892_v48, %v1741_v20  ;;  %v1894_v37 = vpop.f32.mrb[33].mxu0 }
 0x316   : > { %v1895_v19 = vadd.f32 %v1894_v37, %v1741_v20 }
 0x317   : > { %v1980_v29 = vmax.f32 %v1893_v9, 0.0 }
 0x318   : > { %v1981_v60 = vmax.f32 %v1895_v19, 0.0  ;;  %v1898_v3 = vpop.f32.mrb[34].mxu0 }
 0x319   : > { %1988 = vst [vmem:[%s3526_s14] sm:$0xff] %v1980_v29  ;;  %v1899_v41 = vadd.f32 %v1898_v3, %v1746_v34  ;;  %v1900_v39 = vpop.f32.mrb[35].mxu0 }
 0x31a   : > { %1989 = vst [vmem:[%s3526_s14 + $0x8] sm:$0xff] %v1981_v60  ;;  %v1901_v61 = vadd.f32 %v1900_v39, %v1746_v34 }
 0x31b   : > { %v1984_v30 = vmax.f32 %v1899_v41, 0.0 }
 0x31c   : > { %v1985_v21 = vmax.f32 %v1901_v61, 0.0 }
 0x31d   : > { %1992 = vst [vmem:[%s3526_s14 + $0x20] sm:$0xff] %v1984_v30 }
 0x31e   : > { %1993 = vst [vmem:[%s3526_s14 + $0x28] sm:$0xff] %v1985_v21 }
 0x31f   : > { %v1969_v28 = vpop.f32.mrb[32].mxu1 }
 0x320   : > { %v1970_v23 = vadd.f32 %v1969_v28, %v1741_v20  ;;  %v1971_v15 = vpop.f32.mrb[33].mxu1  ;;  %v2018_v38 = vld [vmem:[%s3526_s14] sm:$0xff] (%p2528_p5) }
 0x321   : > { %v1972_v16 = vadd.f32 %v1971_v15, %v1741_v20  ;;  %v2020_v4 = vld [vmem:[%s3526_s14 + $0x8] sm:$0xff] (%p2528_p5)  ;;  %2019 = vst [vmem:[%s2005_s21] sm:$0xff] (%p2528_p5), %v2018_v38 }
 0x322   : > { %v1982_v40 = vmax.f32 %v1970_v23, 0.0  ;;  %2021 = vst [vmem:[%s2005_s21 + $0x8] sm:$0xff] (%p2528_p5), %v2020_v4 }
 0x323   : > { %v1983_v53 = vmax.f32 %v1972_v16, 0.0  ;;  %v1975_v26 = vpop.f32.mrb[34].mxu1  ;;  %2002 = sbr.rel (!%p2528_p5) target bundleno = 818 (0x332), region = 63 }
 0x324   : > { %1990 = vst [vmem:[%s3526_s14 + $0x10] sm:$0xff] %v1982_v40  ;;  %v1976_v18 = vadd.f32 %v1975_v26, %v1746_v34  ;;  %v1977_v5 = vpop.f32.mrb[35].mxu1  ;;  %v2026_v57 = vld [vmem:[%s3526_s14 + $0x20] sm:$0xff] (%p2528_p5) }
 0x325   : > { %1991 = vst [vmem:[%s3526_s14 + $0x18] sm:$0xff] %v1983_v53  ;;  %v1978_v63 = vadd.f32 %v1977_v5, %v1746_v34  ;;  %v2028_v33 = vld [vmem:[%s3526_s14 + $0x28] sm:$0xff] (%p2528_p5)  ;;  %2027 = vst [vmem:[%s2005_s21 + $0x80] sm:$0xff] (%p2528_p5), %v2026_v57 }
 0x326   : > { %v1986_v54 = vmax.f32 %v1976_v18, 0.0  ;;  %2029 = vst [vmem:[%s2005_s21 + $0x88] sm:$0xff] (%p2528_p5), %v2028_v33 }
 0x327   : > { %v1987_v2 = vmax.f32 %v1978_v63, 0.0 }
 0x328   : > { %1994 = vst [vmem:[%s3526_s14 + $0x30] sm:$0xff] %v1986_v54 }
 0x329   : > { %1995 = vst [vmem:[%s3526_s14 + $0x38] sm:$0xff] %v1987_v2 }
 0x32b   : > { %v2022_v47 = vld [vmem:[%s3526_s14 + $0x10] sm:$0xff] }
 0x32c   : > { %v2024_v35 = vld [vmem:[%s3526_s14 + $0x18] sm:$0xff]  ;;  %2023 = vst [vmem:[%s2005_s21 + $0x10] sm:$0xff] %v2022_v47 }
 0x32d   : > { %2025 = vst [vmem:[%s2005_s21 + $0x18] sm:$0xff] %v2024_v35 }
 0x32f   : > { %v2030_v56 = vld [vmem:[%s3526_s14 + $0x30] sm:$0xff] }
 0x330   : > { %v2032_v31 = vld [vmem:[%s3526_s14 + $0x38] sm:$0xff]  ;;  %2031 = vst [vmem:[%s2005_s21 + $0x90] sm:$0xff] %v2030_v56 }
 0x331   : > { %2033 = vst [vmem:[%s2005_s21 + $0x98] sm:$0xff] %v2032_v31 }
 0x332 PF: > { %p11_p10 = scmp.ge.s32.totalorder %s2515_s19, 6   ;;  %s3681_s15 = smov %s2465_s16 }
 0x333   : > { %s3682_s16 = smov %s2526_s22  ;;  %s3683_s17 = smov %s2515_s19 }
 0x334   :  { %13 = sbr.rel (!%p11_p10) target bundleno = 2 (0x2), region = 117 }

</bundles_post_ra>
